<compile_context>
chip_gen: v7x
topology: tpu7x:2x2x1
jax: 0.10.0
libtpu: 0.0.40
codegen_flags: <defaults>
</compile_context>

<pallas_src>
import math
from functools import partial

import jax
import jax.numpy as jnp
from jax.experimental import pallas as pl
from jax.experimental.pallas import tpu as pltpu


# ---------------------------------------------------------------------------
# Fused kernel builder
# ---------------------------------------------------------------------------
def _make_fused_lstm_kernel(T, H, num_layers):
    """Single kernel: stacked LSTM over T steps + tanh(Linear) head.

    Refs:
      x_ref   (T, BP, 1)   f32   input sequence (time-major, batch padded)
      wp_ref  (2*L*H, 4H)  bf16  packed MXU weights:
                                 [ W_hh_0^T (H) | [W_ih_l^T ; W_hh_l^T] (2H) per l>=1 | W_mlp^T pad (H) ]
      fp_ref  (L+2, 4H)    f32   [ w_ih_0 row | b_0 | b_l (l>=1) ... | mlp bias (padded) ]
      y_ref   (BP, 4H)     f32   output slab (cols >= dim_out are zero-padding)
    """
    PW = 4 * H
    L = num_layers

    def kernel(x_ref, wp_ref, fp_ref, y_ref):
        BP = x_ref.shape[1]

        # ---- One-time weight loads; tiny, stay VMEM/vreg resident.
        whh0 = wp_ref[0:H, :]                                       # (H, PW)  bf16
        wcat = [wp_ref[H + 2 * H * (l - 1): H + 2 * H * l, :]       # (2H, PW) bf16
                for l in range(1, L)]
        wmlp = wp_ref[H + 2 * H * (L - 1):, :]                      # (H, PW)  bf16

        w0 = fp_ref[0:1, :]                                         # (1, PW) f32 (0.5-scaled i/f/o cols)
        b0 = fp_ref[1:2, :]                                         # (1, PW)
        bl = [fp_ref[1 + l: 2 + l, :] for l in range(1, L)]         # (1, PW) each
        bmlp = fp_ref[L + 1: L + 2, :]                              # (1, PW)

        # ---- Hoisted layer-0 input projection (+ bias), single fused op off the
        # serial path (D_in == 1 -> pure VPU broadcast multiply).  Vreg-resident.
        gx = x_ref[...] * w0.reshape(1, 1, PW) + b0.reshape(1, 1, PW)   # (T, BP, PW)

        # ---- Lane mask selecting the g (cell candidate) columns.  The i/f/o columns
        # were pre-scaled by 0.5, so sigmoid(z) = 0.5*tanh(z/2)+0.5 becomes one
        # full-width tanh + a masked affine.
        lane = jax.lax.broadcasted_iota(jnp.int32, (BP, PW), 1)
        is_g = (lane >= 2 * H) & (lane < 3 * H)

        def cell(gates, c_prev):
            tg = jnp.tanh(gates)                                    # single full-width EUP op
            a = jnp.where(is_g, tg, 0.5 * tg + 0.5)                 # i/f/o = sigmoid, g = tanh
            i = a[:, 0 * H:1 * H]
            f = a[:, 1 * H:2 * H]
            g = a[:, 2 * H:3 * H]
            o = a[:, 3 * H:4 * H]
            c_new = f * c_prev + i * g
            h_new = o * jnp.tanh(c_new)
            return h_new, c_new

        h = [jnp.zeros((BP, H), jnp.float32) for _ in range(L)]
        hb = [jnp.zeros((BP, H), jnp.bfloat16) for _ in range(L)]
        c = [jnp.zeros((BP, H), jnp.float32) for _ in range(L)]

        # ---- Sequential recurrence, fully unrolled (T small & static).
        for t in range(T):
            # Layer 0: only h @ W_hh is on the serial MXU path (input proj precomputed).
            gates0 = gx[t] + jnp.dot(hb[0], whh0, preferred_element_type=jnp.float32)
            h[0], c[0] = cell(gates0, c[0])
            hb[0] = h[0].astype(jnp.bfloat16)
            # Stacked layers: one fused matmul over [h_below | h_self] (K = 2H).
            for l in range(1, L):
                hin = jnp.concatenate([hb[l - 1], hb[l]], axis=1)   # (BP, 2H) bf16
                gates = (jnp.dot(hin, wcat[l - 1], preferred_element_type=jnp.float32)
                         + bl[l - 1])
                h[l], c[l] = cell(gates, c[l])
                hb[l] = h[l].astype(jnp.bfloat16)

        # ---- MLP head + tanh on the final top-layer hidden state; lane-dense store.
        y = jnp.dot(hb[L - 1], wmlp, preferred_element_type=jnp.float32) + bmlp
        y_ref[...] = jnp.tanh(y)

    return kernel


# ---------------------------------------------------------------------------
# Wrapper
# ---------------------------------------------------------------------------
@partial(jax.jit, static_argnames=("dim_out",))
def lstm_forward(x, wp, fp, dim_out):
    """x: (B, T) -> (B, dim_out). Matches LSTM.forward with act_out = tanh."""
    B, T = x.shape
    PW = wp.shape[1]
    H = PW // 4
    L = wp.shape[0] // (2 * H)

    BP = max(8, ((B + 7) // 8) * 8)  # pad batch to the sublane count

    # (B, T) -> time-major (T, BP, 1)  (D_in = 1 after unsqueeze)
    x_seq = jnp.transpose(x.astype(jnp.float32))[:, :, None]
    if BP != B:
        x_seq = jnp.pad(x_seq, ((0, 0), (0, BP - B), (0, 0)))

    y_pad = pl.pallas_call(
        _make_fused_lstm_kernel(T, H, L),
        out_shape=jax.ShapeDtypeStruct((BP, PW), jnp.float32),
        in_specs=[
            pl.BlockSpec((T, BP, 1), lambda: (0, 0, 0)),
            pl.BlockSpec(wp.shape, lambda: (0, 0)),
            pl.BlockSpec(fp.shape, lambda: (0, 0)),
        ],
        out_specs=pl.BlockSpec((BP, PW), lambda: (0, 0)),
    )(x_seq, wp, fp)
    return y_pad[:B, :dim_out]


# ---------------------------------------------------------------------------
# Parameter construction (deterministic, mirrors initializeWeights) + packing
# ---------------------------------------------------------------------------
def xavier_uniform(key, shape):
    # PyTorch xavier_uniform_ for 2D: fan_out = shape[0], fan_in = shape[1]
    fan_out, fan_in = shape
    bound = math.sqrt(6.0 / (fan_in + fan_out))
    return jax.random.uniform(key, shape, jnp.float32, minval=-bound, maxval=bound)


def init_params(key, input_size, hidden_size, num_layers, dim_out):
    """PyTorch-layout parameters (weights as in nn.LSTM / nn.Linear)."""
    params = {"layers": []}
    for layer in range(num_layers):
        d_in = input_size if layer == 0 else hidden_size
        key, k1, k2 = jax.random.split(key, 3)
        params["layers"].append(dict(
            w_ih=xavier_uniform(k1, (4 * hidden_size, d_in)),        # weight_ih_l{k}
            w_hh=xavier_uniform(k2, (4 * hidden_size, hidden_size)),  # weight_hh_l{k}
            b_ih=jnp.full((4 * hidden_size,), 0.001, jnp.float32),
            b_hh=jnp.full((4 * hidden_size,), 0.001, jnp.float32),
        ))
    key, k3 = jax.random.split(key)
    params["mlp_w"] = xavier_uniform(k3, (dim_out, hidden_size))
    params["mlp_b"] = jnp.full((dim_out,), 0.001, jnp.float32)
    return params


def pack_params(params):
    """Pack everything into 2 arrays: bf16 MXU weights + f32 biases/row0.

    i/f/o gate columns are pre-scaled by 0.5 so the kernel can use the
    sigmoid(z) = 0.5*tanh(z/2)+0.5 identity with a single full-width tanh.
    """
    L = len(params["layers"])
    H = params["layers"][0]["w_hh"].shape[1]
    PW = 4 * H
    O = params["mlp_w"].shape[0]
    assert O <= PW, "dim_out must fit in the 4H-wide packed lane width"
    assert params["layers"][0]["w_ih"].shape[1] == 1, "forward() implies input_size == 1"

    # column scale: [i, f] -> 0.5, [g] -> 1.0, [o] -> 0.5   (PyTorch gate order)
    s = jnp.concatenate([jnp.full((2 * H,), 0.5, jnp.float32),
                         jnp.ones((H,), jnp.float32),
                         jnp.full((H,), 0.5, jnp.float32)])

    l0 = params["layers"][0]
    fp_rows = [l0["w_ih"].T * s[None, :],                            # (1, PW)
               ((l0["b_ih"] + l0["b_hh"]) * s)[None, :]]             # (1, PW)
    wp_rows = [l0["w_hh"].T * s[None, :]]                            # (H, PW)
    for l in range(1, L):
        lp = params["layers"][l]
        wp_rows.append(jnp.concatenate([lp["w_ih"].T * s[None, :],
                                        lp["w_hh"].T * s[None, :]], axis=0))  # (2H, PW)
        fp_rows.append(((lp["b_ih"] + lp["b_hh"]) * s)[None, :])
    wp_rows.append(jnp.pad(params["mlp_w"].T, ((0, 0), (0, PW - O))))          # (H, PW)
    fp_rows.append(jnp.pad(params["mlp_b"], (0, PW - O))[None, :])             # (1, PW)

    wp = jnp.concatenate(wp_rows, axis=0).astype(jnp.bfloat16)       # (2LH, PW)
    fp = jnp.concatenate(fp_rows, axis=0).astype(jnp.float32)        # (L+2, PW)
    return wp, fp


# ---------------------------------------------------------------------------
# Pure-JAX f32 reference (direct transcription of the PyTorch forward)
# ---------------------------------------------------------------------------
def lstm_reference(x, params):
    B, T = x.shape
    L = len(params["layers"])
    H = params["layers"][0]["w_hh"].shape[1]
    h = [jnp.zeros((B, H), jnp.float32) for _ in range(L)]
    c = [jnp.zeros((B, H), jnp.float32) for _ in range(L)]
    xs = x.astype(jnp.float32)[:, :, None]           # (B, T, 1)
    for t in range(T):
        inp = xs[:, t, :]
        for l in range(L):
            p = params["layers"][l]
            gates = inp @ p["w_ih"].T + h[l] @ p["w_hh"].T + p["b_ih"] + p["b_hh"]
            i = jax.nn.sigmoid(gates[:, 0 * H:1 * H])
            f = jax.nn.sigmoid(gates[:, 1 * H:2 * H])
            g = jnp.tanh(gates[:, 2 * H:3 * H])
            o = jax.nn.sigmoid(gates[:, 3 * H:4 * H])
            c[l] = f * c[l] + i * g
            h[l] = o * jnp.tanh(c[l])
            inp = h[l]
    y = h[-1] @ params["mlp_w"].T + params["mlp_b"]
    return jnp.tanh(y)


if __name__ == "__main__":
    # Module hyperparameters implied by forward(): input_size must be 1.
    input_size = 1
    hidden_size = 32
    num_layers = 2
    dim_out = 4
    batch, seq = 2, 8

    key = jax.random.PRNGKey(0)
    k_params, k_x = jax.random.split(key)
    params = init_params(k_params, input_size, hidden_size, num_layers, dim_out)
    wp, fp = pack_params(params)

    x = jax.random.normal(k_x, (batch, seq), jnp.float32)

    # TODO(synk): `activations.getActivation(act_out)` is external; tanh assumed.
    y = lstm_forward(x, wp, fp, dim_out)
    jax.block_until_ready(y)
    assert y.shape == (batch, dim_out)

    # Correctness vs. f32 reference (bf16 MXU operands -> loose tolerance).
    y_ref = lstm_reference(x, params)
    assert jnp.allclose(y, y_ref, atol=5e-2, rtol=5e-2), (
        f"mismatch: max abs err {float(jnp.max(jnp.abs(y - y_ref)))}")

    print("KERNEL_OK")
</pallas_src>

<mosaic_0001>
module attributes {stable_mosaic.version = 11 : i64} {
  func.func @kernel(%arg0: memref<8x8x1xf32, #tpu.memory_space<vmem>>, %arg1: memref<128x128xbf16, #tpu.memory_space<vmem>>, %arg2: memref<4x128xf32, #tpu.memory_space<vmem>>, %arg3: memref<8x128xf32, #tpu.memory_space<vmem>>) attributes {dimension_semantics = [], scalar_prefetch = 0 : i64, scratch_operands = 0 : i64, tpu.core_type = #tpu.core_type<tc>} {
    %c0 = arith.constant 0 : index
    %c0_0 = arith.constant 0 : index
    %0 = vector.load %arg1[%c0, %c0_0] : memref<128x128xbf16, #tpu.memory_space<vmem>>, vector<32x128xbf16>
    %c32 = arith.constant 32 : index
    %c0_1 = arith.constant 0 : index
    %1 = vector.load %arg1[%c32, %c0_1] : memref<128x128xbf16, #tpu.memory_space<vmem>>, vector<64x128xbf16>
    %c96 = arith.constant 96 : index
    %c0_2 = arith.constant 0 : index
    %2 = vector.load %arg1[%c96, %c0_2] : memref<128x128xbf16, #tpu.memory_space<vmem>>, vector<32x128xbf16>
    %c0_3 = arith.constant 0 : index
    %c0_4 = arith.constant 0 : index
    %3 = vector.load %arg2[%c0_3, %c0_4] : memref<4x128xf32, #tpu.memory_space<vmem>>, vector<1x128xf32>
    %c1 = arith.constant 1 : index
    %c0_5 = arith.constant 0 : index
    %4 = vector.load %arg2[%c1, %c0_5] : memref<4x128xf32, #tpu.memory_space<vmem>>, vector<1x128xf32>
    %c2 = arith.constant 2 : index
    %c0_6 = arith.constant 0 : index
    %5 = vector.load %arg2[%c2, %c0_6] : memref<4x128xf32, #tpu.memory_space<vmem>>, vector<1x128xf32>
    %c3 = arith.constant 3 : index
    %c0_7 = arith.constant 0 : index
    %6 = vector.load %arg2[%c3, %c0_7] : memref<4x128xf32, #tpu.memory_space<vmem>>, vector<1x128xf32>
    %c0_8 = arith.constant 0 : index
    %c0_9 = arith.constant 0 : index
    %c0_10 = arith.constant 0 : index
    %7 = vector.load %arg0[%c0_8, %c0_9, %c0_10] : memref<8x8x1xf32, #tpu.memory_space<vmem>>, vector<8x8x1xf32>
    %8 = vector.shape_cast %3 : vector<1x128xf32> to vector<1x1x128xf32>
    %9 = vector.broadcast %7 : vector<8x8x1xf32> to vector<8x8x128xf32>
    %10 = vector.broadcast %8 : vector<1x1x128xf32> to vector<8x8x128xf32>
    %11 = arith.mulf %9, %10 : vector<8x8x128xf32>
    %12 = vector.shape_cast %4 : vector<1x128xf32> to vector<1x1x128xf32>
    %13 = vector.broadcast %12 : vector<1x1x128xf32> to vector<8x8x128xf32>
    %14 = arith.addf %11, %13 : vector<8x8x128xf32>
    %15 = tpu.iota {dimensions = array<i32: 1>} : vector<8x128xi32>
    %c64_i32 = arith.constant 64 : i32
    %16 = vector.broadcast %c64_i32 : i32 to vector<8x128xi32>
    %17 = arith.cmpi sge, %15, %16 : vector<8x128xi32>
    %c96_i32 = arith.constant 96 : i32
    %18 = vector.broadcast %c96_i32 : i32 to vector<8x128xi32>
    %19 = arith.cmpi slt, %15, %18 : vector<8x128xi32>
    %20 = arith.andi %17, %19 : vector<8x128xi1>
    %cst = arith.constant 0.000000e+00 : bf16
    %21 = vector.broadcast %cst : bf16 to vector<8x32xbf16>
    %cst_11 = arith.constant 0.000000e+00 : bf16
    %22 = vector.broadcast %cst_11 : bf16 to vector<8x32xbf16>
    %cst_12 = arith.constant 0.000000e+00 : f32
    %23 = vector.broadcast %cst_12 : f32 to vector<8x32xf32>
    %cst_13 = arith.constant 0.000000e+00 : f32
    %24 = vector.broadcast %cst_13 : f32 to vector<8x32xf32>
    %25 = vector.extract_strided_slice %14 {offsets = [0, 0, 0], sizes = [1, 8, 128], strides = [1, 1, 1]} : vector<8x8x128xf32> to vector<1x8x128xf32>
    %26 = vector.shape_cast %25 : vector<1x8x128xf32> to vector<8x128xf32>
    %cst_14 = arith.constant dense<0.000000e+00> : vector<8x128xf32>
    %27 = tpu.matmul %21, %0, %cst_14 {dimension_numbers = #tpu.dot_dimension_numbers<[1], [0], [0], [1], [0, 0, 1, 1], [], []>} : vector<8x32xbf16>, vector<32x128xbf16>, vector<8x128xf32> -> vector<8x128xf32>
    %28 = arith.addf %26, %27 : vector<8x128xf32>
    %29 = math.tanh %28 : vector<8x128xf32>
    %cst_15 = arith.constant 5.000000e-01 : f32
    %30 = vector.broadcast %cst_15 : f32 to vector<8x128xf32>
    %31 = arith.mulf %30, %29 : vector<8x128xf32>
    %cst_16 = arith.constant 5.000000e-01 : f32
    %32 = vector.broadcast %cst_16 : f32 to vector<8x128xf32>
    %33 = arith.addf %31, %32 : vector<8x128xf32>
    %34 = arith.select %20, %29, %33 : vector<8x128xi1>, vector<8x128xf32>
    %35 = vector.extract_strided_slice %34 {offsets = [0, 0], sizes = [8, 32], strides = [1, 1]} : vector<8x128xf32> to vector<8x32xf32>
    %36 = vector.extract_strided_slice %34 {offsets = [0, 32], sizes = [8, 32], strides = [1, 1]} : vector<8x128xf32> to vector<8x32xf32>
    %37 = vector.extract_strided_slice %34 {offsets = [0, 64], sizes = [8, 32], strides = [1, 1]} : vector<8x128xf32> to vector<8x32xf32>
    %38 = vector.extract_strided_slice %34 {offsets = [0, 96], sizes = [8, 32], strides = [1, 1]} : vector<8x128xf32> to vector<8x32xf32>
    %39 = arith.mulf %36, %23 : vector<8x32xf32>
    %40 = arith.mulf %35, %37 : vector<8x32xf32>
    %41 = arith.addf %39, %40 : vector<8x32xf32>
    %42 = math.tanh %41 : vector<8x32xf32>
    %43 = arith.mulf %38, %42 : vector<8x32xf32>
    %44 = arith.truncf %43 : vector<8x32xf32> to vector<8x32xbf16>
    %45 = tpu.concatenate %44, %22 in 1 : vector<8x32xbf16>, vector<8x32xbf16> -> vector<8x64xbf16>
    %cst_17 = arith.constant dense<0.000000e+00> : vector<8x128xf32>
    %46 = tpu.matmul %45, %1, %cst_17 {dimension_numbers = #tpu.dot_dimension_numbers<[1], [0], [0], [1], [0, 0, 1, 1], [], []>} : vector<8x64xbf16>, vector<64x128xbf16>, vector<8x128xf32> -> vector<8x128xf32>
    %47 = vector.broadcast %5 : vector<1x128xf32> to vector<8x128xf32>
    %48 = arith.addf %46, %47 : vector<8x128xf32>
    %49 = math.tanh %48 : vector<8x128xf32>
    %cst_18 = arith.constant 5.000000e-01 : f32
    %50 = vector.broadcast %cst_18 : f32 to vector<8x128xf32>
    %51 = arith.mulf %50, %49 : vector<8x128xf32>
    %cst_19 = arith.constant 5.000000e-01 : f32
    %52 = vector.broadcast %cst_19 : f32 to vector<8x128xf32>
    %53 = arith.addf %51, %52 : vector<8x128xf32>
    %54 = arith.select %20, %49, %53 : vector<8x128xi1>, vector<8x128xf32>
    %55 = vector.extract_strided_slice %54 {offsets = [0, 0], sizes = [8, 32], strides = [1, 1]} : vector<8x128xf32> to vector<8x32xf32>
    %56 = vector.extract_strided_slice %54 {offsets = [0, 32], sizes = [8, 32], strides = [1, 1]} : vector<8x128xf32> to vector<8x32xf32>
    %57 = vector.extract_strided_slice %54 {offsets = [0, 64], sizes = [8, 32], strides = [1, 1]} : vector<8x128xf32> to vector<8x32xf32>
    %58 = vector.extract_strided_slice %54 {offsets = [0, 96], sizes = [8, 32], strides = [1, 1]} : vector<8x128xf32> to vector<8x32xf32>
    %59 = arith.mulf %56, %24 : vector<8x32xf32>
    %60 = arith.mulf %55, %57 : vector<8x32xf32>
    %61 = arith.addf %59, %60 : vector<8x32xf32>
    %62 = math.tanh %61 : vector<8x32xf32>
    %63 = arith.mulf %58, %62 : vector<8x32xf32>
    %64 = arith.truncf %63 : vector<8x32xf32> to vector<8x32xbf16>
    %65 = vector.extract_strided_slice %14 {offsets = [1, 0, 0], sizes = [1, 8, 128], strides = [1, 1, 1]} : vector<8x8x128xf32> to vector<1x8x128xf32>
    %66 = vector.shape_cast %65 : vector<1x8x128xf32> to vector<8x128xf32>
    %cst_20 = arith.constant dense<0.000000e+00> : vector<8x128xf32>
    %67 = tpu.matmul %44, %0, %cst_20 {dimension_numbers = #tpu.dot_dimension_numbers<[1], [0], [0], [1], [0, 0, 1, 1], [], []>} : vector<8x32xbf16>, vector<32x128xbf16>, vector<8x128xf32> -> vector<8x128xf32>
    %68 = arith.addf %66, %67 : vector<8x128xf32>
    %69 = math.tanh %68 : vector<8x128xf32>
    %cst_21 = arith.constant 5.000000e-01 : f32
    %70 = vector.broadcast %cst_21 : f32 to vector<8x128xf32>
    %71 = arith.mulf %70, %69 : vector<8x128xf32>
    %cst_22 = arith.constant 5.000000e-01 : f32
    %72 = vector.broadcast %cst_22 : f32 to vector<8x128xf32>
    %73 = arith.addf %71, %72 : vector<8x128xf32>
    %74 = arith.select %20, %69, %73 : vector<8x128xi1>, vector<8x128xf32>
    %75 = vector.extract_strided_slice %74 {offsets = [0, 0], sizes = [8, 32], strides = [1, 1]} : vector<8x128xf32> to vector<8x32xf32>
    %76 = vector.extract_strided_slice %74 {offsets = [0, 32], sizes = [8, 32], strides = [1, 1]} : vector<8x128xf32> to vector<8x32xf32>
    %77 = vector.extract_strided_slice %74 {offsets = [0, 64], sizes = [8, 32], strides = [1, 1]} : vector<8x128xf32> to vector<8x32xf32>
    %78 = vector.extract_strided_slice %74 {offsets = [0, 96], sizes = [8, 32], strides = [1, 1]} : vector<8x128xf32> to vector<8x32xf32>
    %79 = arith.mulf %76, %41 : vector<8x32xf32>
    %80 = arith.mulf %75, %77 : vector<8x32xf32>
    %81 = arith.addf %79, %80 : vector<8x32xf32>
    %82 = math.tanh %81 : vector<8x32xf32>
    %83 = arith.mulf %78, %82 : vector<8x32xf32>
    %84 = arith.truncf %83 : vector<8x32xf32> to vector<8x32xbf16>
    %85 = tpu.concatenate %84, %64 in 1 : vector<8x32xbf16>, vector<8x32xbf16> -> vector<8x64xbf16>
    %cst_23 = arith.constant dense<0.000000e+00> : vector<8x128xf32>
    %86 = tpu.matmul %85, %1, %cst_23 {dimension_numbers = #tpu.dot_dimension_numbers<[1], [0], [0], [1], [0, 0, 1, 1], [], []>} : vector<8x64xbf16>, vector<64x128xbf16>, vector<8x128xf32> -> vector<8x128xf32>
    %87 = vector.broadcast %5 : vector<1x128xf32> to vector<8x128xf32>
    %88 = arith.addf %86, %87 : vector<8x128xf32>
    %89 = math.tanh %88 : vector<8x128xf32>
    %cst_24 = arith.constant 5.000000e-01 : f32
    %90 = vector.broadcast %cst_24 : f32 to vector<8x128xf32>
    %91 = arith.mulf %90, %89 : vector<8x128xf32>
    %cst_25 = arith.constant 5.000000e-01 : f32
    %92 = vector.broadcast %cst_25 : f32 to vector<8x128xf32>
    %93 = arith.addf %91, %92 : vector<8x128xf32>
    %94 = arith.select %20, %89, %93 : vector<8x128xi1>, vector<8x128xf32>
    %95 = vector.extract_strided_slice %94 {offsets = [0, 0], sizes = [8, 32], strides = [1, 1]} : vector<8x128xf32> to vector<8x32xf32>
    %96 = vector.extract_strided_slice %94 {offsets = [0, 32], sizes = [8, 32], strides = [1, 1]} : vector<8x128xf32> to vector<8x32xf32>
    %97 = vector.extract_strided_slice %94 {offsets = [0, 64], sizes = [8, 32], strides = [1, 1]} : vector<8x128xf32> to vector<8x32xf32>
    %98 = vector.extract_strided_slice %94 {offsets = [0, 96], sizes = [8, 32], strides = [1, 1]} : vector<8x128xf32> to vector<8x32xf32>
    %99 = arith.mulf %96, %61 : vector<8x32xf32>
    %100 = arith.mulf %95, %97 : vector<8x32xf32>
    %101 = arith.addf %99, %100 : vector<8x32xf32>
    %102 = math.tanh %101 : vector<8x32xf32>
    %103 = arith.mulf %98, %102 : vector<8x32xf32>
    %104 = arith.truncf %103 : vector<8x32xf32> to vector<8x32xbf16>
    %105 = vector.extract_strided_slice %14 {offsets = [2, 0, 0], sizes = [1, 8, 128], strides = [1, 1, 1]} : vector<8x8x128xf32> to vector<1x8x128xf32>
    %106 = vector.shape_cast %105 : vector<1x8x128xf32> to vector<8x128xf32>
    %cst_26 = arith.constant dense<0.000000e+00> : vector<8x128xf32>
    %107 = tpu.matmul %84, %0, %cst_26 {dimension_numbers = #tpu.dot_dimension_numbers<[1], [0], [0], [1], [0, 0, 1, 1], [], []>} : vector<8x32xbf16>, vector<32x128xbf16>, vector<8x128xf32> -> vector<8x128xf32>
    %108 = arith.addf %106, %107 : vector<8x128xf32>
    %109 = math.tanh %108 : vector<8x128xf32>
    %cst_27 = arith.constant 5.000000e-01 : f32
    %110 = vector.broadcast %cst_27 : f32 to vector<8x128xf32>
    %111 = arith.mulf %110, %109 : vector<8x128xf32>
    %cst_28 = arith.constant 5.000000e-01 : f32
    %112 = vector.broadcast %cst_28 : f32 to vector<8x128xf32>
    %113 = arith.addf %111, %112 : vector<8x128xf32>
    %114 = arith.select %20, %109, %113 : vector<8x128xi1>, vector<8x128xf32>
    %115 = vector.extract_strided_slice %114 {offsets = [0, 0], sizes = [8, 32], strides = [1, 1]} : vector<8x128xf32> to vector<8x32xf32>
    %116 = vector.extract_strided_slice %114 {offsets = [0, 32], sizes = [8, 32], strides = [1, 1]} : vector<8x128xf32> to vector<8x32xf32>
    %117 = vector.extract_strided_slice %114 {offsets = [0, 64], sizes = [8, 32], strides = [1, 1]} : vector<8x128xf32> to vector<8x32xf32>
    %118 = vector.extract_strided_slice %114 {offsets = [0, 96], sizes = [8, 32], strides = [1, 1]} : vector<8x128xf32> to vector<8x32xf32>
    %119 = arith.mulf %116, %81 : vector<8x32xf32>
    %120 = arith.mulf %115, %117 : vector<8x32xf32>
    %121 = arith.addf %119, %120 : vector<8x32xf32>
    %122 = math.tanh %121 : vector<8x32xf32>
    %123 = arith.mulf %118, %122 : vector<8x32xf32>
    %124 = arith.truncf %123 : vector<8x32xf32> to vector<8x32xbf16>
    %125 = tpu.concatenate %124, %104 in 1 : vector<8x32xbf16>, vector<8x32xbf16> -> vector<8x64xbf16>
    %cst_29 = arith.constant dense<0.000000e+00> : vector<8x128xf32>
    %126 = tpu.matmul %125, %1, %cst_29 {dimension_numbers = #tpu.dot_dimension_numbers<[1], [0], [0], [1], [0, 0, 1, 1], [], []>} : vector<8x64xbf16>, vector<64x128xbf16>, vector<8x128xf32> -> vector<8x128xf32>
    %127 = vector.broadcast %5 : vector<1x128xf32> to vector<8x128xf32>
    %128 = arith.addf %126, %127 : vector<8x128xf32>
    %129 = math.tanh %128 : vector<8x128xf32>
    %cst_30 = arith.constant 5.000000e-01 : f32
    %130 = vector.broadcast %cst_30 : f32 to vector<8x128xf32>
    %131 = arith.mulf %130, %129 : vector<8x128xf32>
    %cst_31 = arith.constant 5.000000e-01 : f32
    %132 = vector.broadcast %cst_31 : f32 to vector<8x128xf32>
    %133 = arith.addf %131, %132 : vector<8x128xf32>
    %134 = arith.select %20, %129, %133 : vector<8x128xi1>, vector<8x128xf32>
    %135 = vector.extract_strided_slice %134 {offsets = [0, 0], sizes = [8, 32], strides = [1, 1]} : vector<8x128xf32> to vector<8x32xf32>
    %136 = vector.extract_strided_slice %134 {offsets = [0, 32], sizes = [8, 32], strides = [1, 1]} : vector<8x128xf32> to vector<8x32xf32>
    %137 = vector.extract_strided_slice %134 {offsets = [0, 64], sizes = [8, 32], strides = [1, 1]} : vector<8x128xf32> to vector<8x32xf32>
    %138 = vector.extract_strided_slice %134 {offsets = [0, 96], sizes = [8, 32], strides = [1, 1]} : vector<8x128xf32> to vector<8x32xf32>
    %139 = arith.mulf %136, %101 : vector<8x32xf32>
    %140 = arith.mulf %135, %137 : vector<8x32xf32>
    %141 = arith.addf %139, %140 : vector<8x32xf32>
    %142 = math.tanh %141 : vector<8x32xf32>
    %143 = arith.mulf %138, %142 : vector<8x32xf32>
    %144 = arith.truncf %143 : vector<8x32xf32> to vector<8x32xbf16>
    %145 = vector.extract_strided_slice %14 {offsets = [3, 0, 0], sizes = [1, 8, 128], strides = [1, 1, 1]} : vector<8x8x128xf32> to vector<1x8x128xf32>
    %146 = vector.shape_cast %145 : vector<1x8x128xf32> to vector<8x128xf32>
    %cst_32 = arith.constant dense<0.000000e+00> : vector<8x128xf32>
    %147 = tpu.matmul %124, %0, %cst_32 {dimension_numbers = #tpu.dot_dimension_numbers<[1], [0], [0], [1], [0, 0, 1, 1], [], []>} : vector<8x32xbf16>, vector<32x128xbf16>, vector<8x128xf32> -> vector<8x128xf32>
    %148 = arith.addf %146, %147 : vector<8x128xf32>
    %149 = math.tanh %148 : vector<8x128xf32>
    %cst_33 = arith.constant 5.000000e-01 : f32
    %150 = vector.broadcast %cst_33 : f32 to vector<8x128xf32>
    %151 = arith.mulf %150, %149 : vector<8x128xf32>
    %cst_34 = arith.constant 5.000000e-01 : f32
    %152 = vector.broadcast %cst_34 : f32 to vector<8x128xf32>
    %153 = arith.addf %151, %152 : vector<8x128xf32>
    %154 = arith.select %20, %149, %153 : vector<8x128xi1>, vector<8x128xf32>
    %155 = vector.extract_strided_slice %154 {offsets = [0, 0], sizes = [8, 32], strides = [1, 1]} : vector<8x128xf32> to vector<8x32xf32>
    %156 = vector.extract_strided_slice %154 {offsets = [0, 32], sizes = [8, 32], strides = [1, 1]} : vector<8x128xf32> to vector<8x32xf32>
    %157 = vector.extract_strided_slice %154 {offsets = [0, 64], sizes = [8, 32], strides = [1, 1]} : vector<8x128xf32> to vector<8x32xf32>
    %158 = vector.extract_strided_slice %154 {offsets = [0, 96], sizes = [8, 32], strides = [1, 1]} : vector<8x128xf32> to vector<8x32xf32>
    %159 = arith.mulf %156, %121 : vector<8x32xf32>
    %160 = arith.mulf %155, %157 : vector<8x32xf32>
    %161 = arith.addf %159, %160 : vector<8x32xf32>
    %162 = math.tanh %161 : vector<8x32xf32>
    %163 = arith.mulf %158, %162 : vector<8x32xf32>
    %164 = arith.truncf %163 : vector<8x32xf32> to vector<8x32xbf16>
    %165 = tpu.concatenate %164, %144 in 1 : vector<8x32xbf16>, vector<8x32xbf16> -> vector<8x64xbf16>
    %cst_35 = arith.constant dense<0.000000e+00> : vector<8x128xf32>
    %166 = tpu.matmul %165, %1, %cst_35 {dimension_numbers = #tpu.dot_dimension_numbers<[1], [0], [0], [1], [0, 0, 1, 1], [], []>} : vector<8x64xbf16>, vector<64x128xbf16>, vector<8x128xf32> -> vector<8x128xf32>
    %167 = vector.broadcast %5 : vector<1x128xf32> to vector<8x128xf32>
    %168 = arith.addf %166, %167 : vector<8x128xf32>
    %169 = math.tanh %168 : vector<8x128xf32>
    %cst_36 = arith.constant 5.000000e-01 : f32
    %170 = vector.broadcast %cst_36 : f32 to vector<8x128xf32>
    %171 = arith.mulf %170, %169 : vector<8x128xf32>
    %cst_37 = arith.constant 5.000000e-01 : f32
    %172 = vector.broadcast %cst_37 : f32 to vector<8x128xf32>
    %173 = arith.addf %171, %172 : vector<8x128xf32>
    %174 = arith.select %20, %169, %173 : vector<8x128xi1>, vector<8x128xf32>
    %175 = vector.extract_strided_slice %174 {offsets = [0, 0], sizes = [8, 32], strides = [1, 1]} : vector<8x128xf32> to vector<8x32xf32>
    %176 = vector.extract_strided_slice %174 {offsets = [0, 32], sizes = [8, 32], strides = [1, 1]} : vector<8x128xf32> to vector<8x32xf32>
    %177 = vector.extract_strided_slice %174 {offsets = [0, 64], sizes = [8, 32], strides = [1, 1]} : vector<8x128xf32> to vector<8x32xf32>
    %178 = vector.extract_strided_slice %174 {offsets = [0, 96], sizes = [8, 32], strides = [1, 1]} : vector<8x128xf32> to vector<8x32xf32>
    %179 = arith.mulf %176, %141 : vector<8x32xf32>
    %180 = arith.mulf %175, %177 : vector<8x32xf32>
    %181 = arith.addf %179, %180 : vector<8x32xf32>
    %182 = math.tanh %181 : vector<8x32xf32>
    %183 = arith.mulf %178, %182 : vector<8x32xf32>
    %184 = arith.truncf %183 : vector<8x32xf32> to vector<8x32xbf16>
    %185 = vector.extract_strided_slice %14 {offsets = [4, 0, 0], sizes = [1, 8, 128], strides = [1, 1, 1]} : vector<8x8x128xf32> to vector<1x8x128xf32>
    %186 = vector.shape_cast %185 : vector<1x8x128xf32> to vector<8x128xf32>
    %cst_38 = arith.constant dense<0.000000e+00> : vector<8x128xf32>
    %187 = tpu.matmul %164, %0, %cst_38 {dimension_numbers = #tpu.dot_dimension_numbers<[1], [0], [0], [1], [0, 0, 1, 1], [], []>} : vector<8x32xbf16>, vector<32x128xbf16>, vector<8x128xf32> -> vector<8x128xf32>
    %188 = arith.addf %186, %187 : vector<8x128xf32>
    %189 = math.tanh %188 : vector<8x128xf32>
    %cst_39 = arith.constant 5.000000e-01 : f32
    %190 = vector.broadcast %cst_39 : f32 to vector<8x128xf32>
    %191 = arith.mulf %190, %189 : vector<8x128xf32>
    %cst_40 = arith.constant 5.000000e-01 : f32
    %192 = vector.broadcast %cst_40 : f32 to vector<8x128xf32>
    %193 = arith.addf %191, %192 : vector<8x128xf32>
    %194 = arith.select %20, %189, %193 : vector<8x128xi1>, vector<8x128xf32>
    %195 = vector.extract_strided_slice %194 {offsets = [0, 0], sizes = [8, 32], strides = [1, 1]} : vector<8x128xf32> to vector<8x32xf32>
    %196 = vector.extract_strided_slice %194 {offsets = [0, 32], sizes = [8, 32], strides = [1, 1]} : vector<8x128xf32> to vector<8x32xf32>
    %197 = vector.extract_strided_slice %194 {offsets = [0, 64], sizes = [8, 32], strides = [1, 1]} : vector<8x128xf32> to vector<8x32xf32>
    %198 = vector.extract_strided_slice %194 {offsets = [0, 96], sizes = [8, 32], strides = [1, 1]} : vector<8x128xf32> to vector<8x32xf32>
    %199 = arith.mulf %196, %161 : vector<8x32xf32>
    %200 = arith.mulf %195, %197 : vector<8x32xf32>
    %201 = arith.addf %199, %200 : vector<8x32xf32>
    %202 = math.tanh %201 : vector<8x32xf32>
    %203 = arith.mulf %198, %202 : vector<8x32xf32>
    %204 = arith.truncf %203 : vector<8x32xf32> to vector<8x32xbf16>
    %205 = tpu.concatenate %204, %184 in 1 : vector<8x32xbf16>, vector<8x32xbf16> -> vector<8x64xbf16>
    %cst_41 = arith.constant dense<0.000000e+00> : vector<8x128xf32>
    %206 = tpu.matmul %205, %1, %cst_41 {dimension_numbers = #tpu.dot_dimension_numbers<[1], [0], [0], [1], [0, 0, 1, 1], [], []>} : vector<8x64xbf16>, vector<64x128xbf16>, vector<8x128xf32> -> vector<8x128xf32>
    %207 = vector.broadcast %5 : vector<1x128xf32> to vector<8x128xf32>
    %208 = arith.addf %206, %207 : vector<8x128xf32>
    %209 = math.tanh %208 : vector<8x128xf32>
    %cst_42 = arith.constant 5.000000e-01 : f32
    %210 = vector.broadcast %cst_42 : f32 to vector<8x128xf32>
    %211 = arith.mulf %210, %209 : vector<8x128xf32>
    %cst_43 = arith.constant 5.000000e-01 : f32
    %212 = vector.broadcast %cst_43 : f32 to vector<8x128xf32>
    %213 = arith.addf %211, %212 : vector<8x128xf32>
    %214 = arith.select %20, %209, %213 : vector<8x128xi1>, vector<8x128xf32>
    %215 = vector.extract_strided_slice %214 {offsets = [0, 0], sizes = [8, 32], strides = [1, 1]} : vector<8x128xf32> to vector<8x32xf32>
    %216 = vector.extract_strided_slice %214 {offsets = [0, 32], sizes = [8, 32], strides = [1, 1]} : vector<8x128xf32> to vector<8x32xf32>
    %217 = vector.extract_strided_slice %214 {offsets = [0, 64], sizes = [8, 32], strides = [1, 1]} : vector<8x128xf32> to vector<8x32xf32>
    %218 = vector.extract_strided_slice %214 {offsets = [0, 96], sizes = [8, 32], strides = [1, 1]} : vector<8x128xf32> to vector<8x32xf32>
    %219 = arith.mulf %216, %181 : vector<8x32xf32>
    %220 = arith.mulf %215, %217 : vector<8x32xf32>
    %221 = arith.addf %219, %220 : vector<8x32xf32>
    %222 = math.tanh %221 : vector<8x32xf32>
    %223 = arith.mulf %218, %222 : vector<8x32xf32>
    %224 = arith.truncf %223 : vector<8x32xf32> to vector<8x32xbf16>
    %225 = vector.extract_strided_slice %14 {offsets = [5, 0, 0], sizes = [1, 8, 128], strides = [1, 1, 1]} : vector<8x8x128xf32> to vector<1x8x128xf32>
    %226 = vector.shape_cast %225 : vector<1x8x128xf32> to vector<8x128xf32>
    %cst_44 = arith.constant dense<0.000000e+00> : vector<8x128xf32>
    %227 = tpu.matmul %204, %0, %cst_44 {dimension_numbers = #tpu.dot_dimension_numbers<[1], [0], [0], [1], [0, 0, 1, 1], [], []>} : vector<8x32xbf16>, vector<32x128xbf16>, vector<8x128xf32> -> vector<8x128xf32>
    %228 = arith.addf %226, %227 : vector<8x128xf32>
    %229 = math.tanh %228 : vector<8x128xf32>
    %cst_45 = arith.constant 5.000000e-01 : f32
    %230 = vector.broadcast %cst_45 : f32 to vector<8x128xf32>
    %231 = arith.mulf %230, %229 : vector<8x128xf32>
    %cst_46 = arith.constant 5.000000e-01 : f32
    %232 = vector.broadcast %cst_46 : f32 to vector<8x128xf32>
    %233 = arith.addf %231, %232 : vector<8x128xf32>
    %234 = arith.select %20, %229, %233 : vector<8x128xi1>, vector<8x128xf32>
    %235 = vector.extract_strided_slice %234 {offsets = [0, 0], sizes = [8, 32], strides = [1, 1]} : vector<8x128xf32> to vector<8x32xf32>
    %236 = vector.extract_strided_slice %234 {offsets = [0, 32], sizes = [8, 32], strides = [1, 1]} : vector<8x128xf32> to vector<8x32xf32>
    %237 = vector.extract_strided_slice %234 {offsets = [0, 64], sizes = [8, 32], strides = [1, 1]} : vector<8x128xf32> to vector<8x32xf32>
    %238 = vector.extract_strided_slice %234 {offsets = [0, 96], sizes = [8, 32], strides = [1, 1]} : vector<8x128xf32> to vector<8x32xf32>
    %239 = arith.mulf %236, %201 : vector<8x32xf32>
    %240 = arith.mulf %235, %237 : vector<8x32xf32>
    %241 = arith.addf %239, %240 : vector<8x32xf32>
    %242 = math.tanh %241 : vector<8x32xf32>
    %243 = arith.mulf %238, %242 : vector<8x32xf32>
    %244 = arith.truncf %243 : vector<8x32xf32> to vector<8x32xbf16>
    %245 = tpu.concatenate %244, %224 in 1 : vector<8x32xbf16>, vector<8x32xbf16> -> vector<8x64xbf16>
    %cst_47 = arith.constant dense<0.000000e+00> : vector<8x128xf32>
    %246 = tpu.matmul %245, %1, %cst_47 {dimension_numbers = #tpu.dot_dimension_numbers<[1], [0], [0], [1], [0, 0, 1, 1], [], []>} : vector<8x64xbf16>, vector<64x128xbf16>, vector<8x128xf32> -> vector<8x128xf32>
    %247 = vector.broadcast %5 : vector<1x128xf32> to vector<8x128xf32>
    %248 = arith.addf %246, %247 : vector<8x128xf32>
    %249 = math.tanh %248 : vector<8x128xf32>
    %cst_48 = arith.constant 5.000000e-01 : f32
    %250 = vector.broadcast %cst_48 : f32 to vector<8x128xf32>
    %251 = arith.mulf %250, %249 : vector<8x128xf32>
    %cst_49 = arith.constant 5.000000e-01 : f32
    %252 = vector.broadcast %cst_49 : f32 to vector<8x128xf32>
    %253 = arith.addf %251, %252 : vector<8x128xf32>
    %254 = arith.select %20, %249, %253 : vector<8x128xi1>, vector<8x128xf32>
    %255 = vector.extract_strided_slice %254 {offsets = [0, 0], sizes = [8, 32], strides = [1, 1]} : vector<8x128xf32> to vector<8x32xf32>
    %256 = vector.extract_strided_slice %254 {offsets = [0, 32], sizes = [8, 32], strides = [1, 1]} : vector<8x128xf32> to vector<8x32xf32>
    %257 = vector.extract_strided_slice %254 {offsets = [0, 64], sizes = [8, 32], strides = [1, 1]} : vector<8x128xf32> to vector<8x32xf32>
    %258 = vector.extract_strided_slice %254 {offsets = [0, 96], sizes = [8, 32], strides = [1, 1]} : vector<8x128xf32> to vector<8x32xf32>
    %259 = arith.mulf %256, %221 : vector<8x32xf32>
    %260 = arith.mulf %255, %257 : vector<8x32xf32>
    %261 = arith.addf %259, %260 : vector<8x32xf32>
    %262 = math.tanh %261 : vector<8x32xf32>
    %263 = arith.mulf %258, %262 : vector<8x32xf32>
    %264 = arith.truncf %263 : vector<8x32xf32> to vector<8x32xbf16>
    %265 = vector.extract_strided_slice %14 {offsets = [6, 0, 0], sizes = [1, 8, 128], strides = [1, 1, 1]} : vector<8x8x128xf32> to vector<1x8x128xf32>
    %266 = vector.shape_cast %265 : vector<1x8x128xf32> to vector<8x128xf32>
    %cst_50 = arith.constant dense<0.000000e+00> : vector<8x128xf32>
    %267 = tpu.matmul %244, %0, %cst_50 {dimension_numbers = #tpu.dot_dimension_numbers<[1], [0], [0], [1], [0, 0, 1, 1], [], []>} : vector<8x32xbf16>, vector<32x128xbf16>, vector<8x128xf32> -> vector<8x128xf32>
    %268 = arith.addf %266, %267 : vector<8x128xf32>
    %269 = math.tanh %268 : vector<8x128xf32>
    %cst_51 = arith.constant 5.000000e-01 : f32
    %270 = vector.broadcast %cst_51 : f32 to vector<8x128xf32>
    %271 = arith.mulf %270, %269 : vector<8x128xf32>
    %cst_52 = arith.constant 5.000000e-01 : f32
    %272 = vector.broadcast %cst_52 : f32 to vector<8x128xf32>
    %273 = arith.addf %271, %272 : vector<8x128xf32>
    %274 = arith.select %20, %269, %273 : vector<8x128xi1>, vector<8x128xf32>
    %275 = vector.extract_strided_slice %274 {offsets = [0, 0], sizes = [8, 32], strides = [1, 1]} : vector<8x128xf32> to vector<8x32xf32>
    %276 = vector.extract_strided_slice %274 {offsets = [0, 32], sizes = [8, 32], strides = [1, 1]} : vector<8x128xf32> to vector<8x32xf32>
    %277 = vector.extract_strided_slice %274 {offsets = [0, 64], sizes = [8, 32], strides = [1, 1]} : vector<8x128xf32> to vector<8x32xf32>
    %278 = vector.extract_strided_slice %274 {offsets = [0, 96], sizes = [8, 32], strides = [1, 1]} : vector<8x128xf32> to vector<8x32xf32>
    %279 = arith.mulf %276, %241 : vector<8x32xf32>
    %280 = arith.mulf %275, %277 : vector<8x32xf32>
    %281 = arith.addf %279, %280 : vector<8x32xf32>
    %282 = math.tanh %281 : vector<8x32xf32>
    %283 = arith.mulf %278, %282 : vector<8x32xf32>
    %284 = arith.truncf %283 : vector<8x32xf32> to vector<8x32xbf16>
    %285 = tpu.concatenate %284, %264 in 1 : vector<8x32xbf16>, vector<8x32xbf16> -> vector<8x64xbf16>
    %cst_53 = arith.constant dense<0.000000e+00> : vector<8x128xf32>
    %286 = tpu.matmul %285, %1, %cst_53 {dimension_numbers = #tpu.dot_dimension_numbers<[1], [0], [0], [1], [0, 0, 1, 1], [], []>} : vector<8x64xbf16>, vector<64x128xbf16>, vector<8x128xf32> -> vector<8x128xf32>
    %287 = vector.broadcast %5 : vector<1x128xf32> to vector<8x128xf32>
    %288 = arith.addf %286, %287 : vector<8x128xf32>
    %289 = math.tanh %288 : vector<8x128xf32>
    %cst_54 = arith.constant 5.000000e-01 : f32
    %290 = vector.broadcast %cst_54 : f32 to vector<8x128xf32>
    %291 = arith.mulf %290, %289 : vector<8x128xf32>
    %cst_55 = arith.constant 5.000000e-01 : f32
    %292 = vector.broadcast %cst_55 : f32 to vector<8x128xf32>
    %293 = arith.addf %291, %292 : vector<8x128xf32>
    %294 = arith.select %20, %289, %293 : vector<8x128xi1>, vector<8x128xf32>
    %295 = vector.extract_strided_slice %294 {offsets = [0, 0], sizes = [8, 32], strides = [1, 1]} : vector<8x128xf32> to vector<8x32xf32>
    %296 = vector.extract_strided_slice %294 {offsets = [0, 32], sizes = [8, 32], strides = [1, 1]} : vector<8x128xf32> to vector<8x32xf32>
    %297 = vector.extract_strided_slice %294 {offsets = [0, 64], sizes = [8, 32], strides = [1, 1]} : vector<8x128xf32> to vector<8x32xf32>
    %298 = vector.extract_strided_slice %294 {offsets = [0, 96], sizes = [8, 32], strides = [1, 1]} : vector<8x128xf32> to vector<8x32xf32>
    %299 = arith.mulf %296, %261 : vector<8x32xf32>
    %300 = arith.mulf %295, %297 : vector<8x32xf32>
    %301 = arith.addf %299, %300 : vector<8x32xf32>
    %302 = math.tanh %301 : vector<8x32xf32>
    %303 = arith.mulf %298, %302 : vector<8x32xf32>
    %304 = arith.truncf %303 : vector<8x32xf32> to vector<8x32xbf16>
    %305 = vector.extract_strided_slice %14 {offsets = [7, 0, 0], sizes = [1, 8, 128], strides = [1, 1, 1]} : vector<8x8x128xf32> to vector<1x8x128xf32>
    %306 = vector.shape_cast %305 : vector<1x8x128xf32> to vector<8x128xf32>
    %cst_56 = arith.constant dense<0.000000e+00> : vector<8x128xf32>
    %307 = tpu.matmul %284, %0, %cst_56 {dimension_numbers = #tpu.dot_dimension_numbers<[1], [0], [0], [1], [0, 0, 1, 1], [], []>} : vector<8x32xbf16>, vector<32x128xbf16>, vector<8x128xf32> -> vector<8x128xf32>
    %308 = arith.addf %306, %307 : vector<8x128xf32>
    %309 = math.tanh %308 : vector<8x128xf32>
    %cst_57 = arith.constant 5.000000e-01 : f32
    %310 = vector.broadcast %cst_57 : f32 to vector<8x128xf32>
    %311 = arith.mulf %310, %309 : vector<8x128xf32>
    %cst_58 = arith.constant 5.000000e-01 : f32
    %312 = vector.broadcast %cst_58 : f32 to vector<8x128xf32>
    %313 = arith.addf %311, %312 : vector<8x128xf32>
    %314 = arith.select %20, %309, %313 : vector<8x128xi1>, vector<8x128xf32>
    %315 = vector.extract_strided_slice %314 {offsets = [0, 0], sizes = [8, 32], strides = [1, 1]} : vector<8x128xf32> to vector<8x32xf32>
    %316 = vector.extract_strided_slice %314 {offsets = [0, 32], sizes = [8, 32], strides = [1, 1]} : vector<8x128xf32> to vector<8x32xf32>
    %317 = vector.extract_strided_slice %314 {offsets = [0, 64], sizes = [8, 32], strides = [1, 1]} : vector<8x128xf32> to vector<8x32xf32>
    %318 = vector.extract_strided_slice %314 {offsets = [0, 96], sizes = [8, 32], strides = [1, 1]} : vector<8x128xf32> to vector<8x32xf32>
    %319 = arith.mulf %316, %281 : vector<8x32xf32>
    %320 = arith.mulf %315, %317 : vector<8x32xf32>
    %321 = arith.addf %319, %320 : vector<8x32xf32>
    %322 = math.tanh %321 : vector<8x32xf32>
    %323 = arith.mulf %318, %322 : vector<8x32xf32>
    %324 = arith.truncf %323 : vector<8x32xf32> to vector<8x32xbf16>
    %325 = tpu.concatenate %324, %304 in 1 : vector<8x32xbf16>, vector<8x32xbf16> -> vector<8x64xbf16>
    %cst_59 = arith.constant dense<0.000000e+00> : vector<8x128xf32>
    %326 = tpu.matmul %325, %1, %cst_59 {dimension_numbers = #tpu.dot_dimension_numbers<[1], [0], [0], [1], [0, 0, 1, 1], [], []>} : vector<8x64xbf16>, vector<64x128xbf16>, vector<8x128xf32> -> vector<8x128xf32>
    %327 = vector.broadcast %5 : vector<1x128xf32> to vector<8x128xf32>
    %328 = arith.addf %326, %327 : vector<8x128xf32>
    %329 = math.tanh %328 : vector<8x128xf32>
    %cst_60 = arith.constant 5.000000e-01 : f32
    %330 = vector.broadcast %cst_60 : f32 to vector<8x128xf32>
    %331 = arith.mulf %330, %329 : vector<8x128xf32>
    %cst_61 = arith.constant 5.000000e-01 : f32
    %332 = vector.broadcast %cst_61 : f32 to vector<8x128xf32>
    %333 = arith.addf %331, %332 : vector<8x128xf32>
    %334 = arith.select %20, %329, %333 : vector<8x128xi1>, vector<8x128xf32>
    %335 = vector.extract_strided_slice %334 {offsets = [0, 0], sizes = [8, 32], strides = [1, 1]} : vector<8x128xf32> to vector<8x32xf32>
    %336 = vector.extract_strided_slice %334 {offsets = [0, 32], sizes = [8, 32], strides = [1, 1]} : vector<8x128xf32> to vector<8x32xf32>
    %337 = vector.extract_strided_slice %334 {offsets = [0, 64], sizes = [8, 32], strides = [1, 1]} : vector<8x128xf32> to vector<8x32xf32>
    %338 = vector.extract_strided_slice %334 {offsets = [0, 96], sizes = [8, 32], strides = [1, 1]} : vector<8x128xf32> to vector<8x32xf32>
    %339 = arith.mulf %336, %301 : vector<8x32xf32>
    %340 = arith.mulf %335, %337 : vector<8x32xf32>
    %341 = arith.addf %339, %340 : vector<8x32xf32>
    %342 = math.tanh %341 : vector<8x32xf32>
    %343 = arith.mulf %338, %342 : vector<8x32xf32>
    %344 = arith.truncf %343 : vector<8x32xf32> to vector<8x32xbf16>
    %cst_62 = arith.constant dense<0.000000e+00> : vector<8x128xf32>
    %345 = tpu.matmul %344, %2, %cst_62 {dimension_numbers = #tpu.dot_dimension_numbers<[1], [0], [0], [1], [0, 0, 1, 1], [], []>} : vector<8x32xbf16>, vector<32x128xbf16>, vector<8x128xf32> -> vector<8x128xf32>
    %346 = vector.broadcast %6 : vector<1x128xf32> to vector<8x128xf32>
    %347 = arith.addf %345, %346 : vector<8x128xf32>
    %348 = math.tanh %347 : vector<8x128xf32>
    %c0_63 = arith.constant 0 : index
    %c0_64 = arith.constant 0 : index
    %349 = vector.load %arg3[%c0_63, %c0_64] : memref<8x128xf32, #tpu.memory_space<vmem>>, vector<8x128xf32>
    tpu.vector_store %arg3[%c0_63, %c0_64], %348 {strides = array<i32>} : memref<8x128xf32, #tpu.memory_space<vmem>>, vector<8x128xf32>,
    return
  }
}

</mosaic_0001>

<bundles_post_ra>
// kernel: lstm_forward.1
= control target key start
LH: loop header
LB: loop body
LE: loop exit
PB: predicated region body
PF: predicated region fallthrough
CT: control target
= control target key end

     0   :  { %v1667_v0 = vmov 0.0   ;;  %vm1668_vm0 = vmmov 0   ;;  %v1669_v2 = vmov 0   ;;  %v107_v15 = vlaneseq  ;;  %s1670_s22 = smov 64   ;;  %s1671_s23 = smov 32   ;;  %s2105_s1 = inlined_call_operand.vmem [shape: bf16[128,128], index: 1, kind: input, shape index: {}]   ;;  %s2106_s0 = inlined_call_operand.vmem [shape: f32[8,8,1], index: 0, kind: input, shape index: {}]   ;;  %s2107_s2 = inlined_call_operand.vmem [shape: f32[4,128], index: 2, kind: input, shape index: {}]   ;;  %s2108_s3 = inlined_call_operand.vmem [shape: f32[8,128], index: 3, kind: output, shape index: {}]  }
   0x1   :  { %1418 = vmatprep.subr.bf16.mxu0 %v1667_v0  ;;  %v1696_v1 = vld [vmem:[%s2105_s1] sm:$0xff]   ;;  %1422 = vmatprep.mubr.msk.bf16.mxu0 %vm1668_vm0, %v1667_v0  ;;  %v1705_v3 = vld [vmem:[%s2105_s1 + $0x8] sm:$0xff]   ;;  %v1747_v27 = vld [vmem:[%s2105_s1 + $0x10] sm:$0xff]   ;;  %vm124_vm4 = vcmask 261120   ;;  %vm224_vm5 = vcmask 523264  }
   0x2   :  { %1591 = vset.pattern.permute.xlu0 %v1669_v2  ;;  %1426 = vmatprep.subr.bf16.mxu1 %v1667_v0  ;;  %v35_v4 = vld [vmem:[%s2106_s0] sm:$0xff]  ;;  %v108_v16 = vand.u32 127, %v107_v15  ;;  %v1753_v28 = vld [vmem:[%s2105_s1 + $0x18] sm:$0xff]   ;;  %v1768_v31 = vld [vmem:[%s2105_s1 + $0x28] sm:$0xff]  }
   0x3   :  { %1419 = vmatpush3.bf16.msra.mxu0 %v1696_v1  ;;  %1434 = vmatprep.mubr.msk.bf16.mxu1 %vm1668_vm0, %v1667_v0  ;;  %v1724_v5 = vld [vmem:[%s2107_s2] ss:$0 sm:$0xff]  ;;  %v1730_v8 = vld [vmem:[%s2107_s2 + $0x1] ss:$0 sm:$0xff]  ;;  %v36_v32 = vld [vmem:[%s2106_s0 + $0x8] sm:$0xff] }
   0x4   :  { %1420 = vmatprep.subr.bf16.mxu0 %v1667_v0  ;;  %45 = vperm.xlu0 %1591, %v35_v4   ;;  %vm109_vm1 = vcmp.ge.s32.totalorder %v108_v16, 64  ;;  %vm110_vm2 = vcmp.lt.s32.totalorder %v108_v16, 96  ;;  %v1760_v29 = vld [vmem:[%s2105_s1 + $0x20] sm:$0xff]   ;;  %v1600_v19 = vld [vmem:[%s2105_s1 + $0x38] sm:$0xff]  }
   0x5   :  { %1592 = vset.pattern.permute.xlu1 %v1669_v2  ;;  %vm1733_vm3 = vmand %vm109_vm1, %vm110_vm2  ;;  %1427 = vmatpush3.bf16.msra.mxu1 %v1747_v27  ;;  %v1801_v41 = vld [vmem:[%s2107_s2 + $0x2] ss:$0 sm:$0xff] }
   0x6   :  { %1428 = vmatprep.subr.bf16.mxu1 %v1667_v0 }
   0x7   :  { %1421 = vmatpush3.bf16.msra.mxu0 %v1705_v3 }
   0x8   :  { %1438 = vmatprep.subr.bf16.mxu0 %v1667_v0 }
   0x9   :  { %1429 = vmatpush3.bf16.msra.mxu1 %v1753_v28 }
   0xa   :  { %1423 = vmatmul.mubr.bf16.vlgmr.msra.gmra.mrb[0].mxu0 %v1669_v2  ;;  %1430 = vmatprep.subr.bf16.mxu1 %v1667_v0 }
   0xb   :  { %1439 = vmatpush3.bf16.msra.mxu0 %v1696_v1  ;;  %1442 = vmatprep.mubr.msk.bf16.mxu0 %vm1668_vm0, %v1667_v0 }
   0xc   :  { %1440 = vmatprep.subr.bf16.mxu0 %v1667_v0 }
   0xd   :  { %1431 = vmatpush3.bf16.msra.mxu1 %v1760_v29 }
   0xe   :  { %1432 = vmatprep.subr.bf16.mxu1 %v1667_v0 }
   0xf   :  { %1441 = vmatpush3.bf16.msra.mxu0 %v1705_v3 }
  0x10   :  { %1446 = vmatprep.subr.bf16.mxu0 %v1667_v0 }
  0x11   :  { %1433 = vmatpush3.bf16.msra.mxu1 %v1768_v31 }
  0x12   :  { %1458 = vmatprep.subr.bf16.mxu1 %v1667_v0 }
  0x83   :  { %v46_v6 = vpop.permute.xlu0 %45 }
  0x84   :  { %v87_v7 = vmul.f32 %v1724_v5, %v46_v6 }
  0x86   :  { %v99_v9 = vadd.f32 %v1730_v8, %v87_v7 }
  0xdd   :  { %v162_v10 = vpop.f32.mrb[0].mxu0 }
  0xde   :  { %v168_v11 = vadd.f32 %v162_v10, %v99_v9  ;;  %v1424_v12 = vpop.f32.mrb[1].mxu0 }
  0xdf   :  { %v165_v13 = vpop.f32.mrb[2].mxu0 }
  0xe0   :  { %1601 = vtanh.f32 %v168_v11  ;;  %v1425_v14 = vpop.f32.mrb[3].mxu0 }
  0xea   :  { %v1602_v17 = vpop.eup %1601 }
  0xeb   :  { %v170_v18 = vmul.f32 0.5, %v1602_v17 }
  0xed   :  { %v171_v20 = vadd.f32 0.5, %v170_v18 }
  0xef   :  { %v172_v21 = vsel %vm1733_vm3, %v1602_v17, %v171_v20  ;;  %v37_v20 = vld [vmem:[%s2106_s0 + $0x10] sm:$0xff] }
  0xf0   :  { %175 = vrot.lane.b32.xlu0 %v172_v21, %s1670_s22  ;;  %v173_v24 = vmul.f32 0.0, %v172_v21 }
 0x162   :  { %v176_v22 = vpop.permute.xlu0 %175 }
 0x163   :  { %v178_v23 = vmul.f32 %v176_v22, %v172_v21 }
 0x165   :  { %180 = vrot.lane.b32.xlu1 %v178_v23, %s1671_s23 }
 0x1d7   :  { %v181_v25 = vpop.permute.xlu1 %180 }
 0x1d8   :  { %v1741_v26 = vadd.f32 %v181_v25, %v173_v24 }
 0x1da   :  { %1603 = vtanh.f32 %v1741_v26 }
 0x1e4   :  { %v1604_v30 = vpop.eup %1603 }
 0x1e5   :  { %186 = vrot.lane.b32.xlu1 %v1604_v30, %s1670_s22 }
 0x1e9   :  { %50 = vperm.xlu1 %1592, %v36_v32  }
 0x257   :  { %v187_v33 = vpop.permute.xlu1 %186 }
 0x258   :  { %v189_v34 = vmul.f32 %v187_v33, %v172_v21 }
 0x25a   :  { %v190_v35 = vpack.c.bf16 %v189_v34, %v189_v34 }
 0x25c   :  { %192 = vrot.lane.b32.xlu0 %v190_v35, %s1671_s23 }
 0x268   :  { %v51_v38 = vpop.permute.xlu1 %50 }
 0x269   :  { %v88_v39 = vmul.f32 %v1724_v5, %v51_v38 }
 0x26b   :  { %v100_v40 = vadd.f32 %v1730_v8, %v88_v39 }
 0x2ce   :  { %v193_v36 = vpop.permute.xlu0 %192 }
 0x2cf   :  { %v195_v37 = vsel %vm124_vm4, %v193_v36, 0  ;;  %1443 = vmatmul.mubr.msk.bf16.vlgmr.msra.gmra.mrb[4].mxu0 %vm124_vm4, %v193_v36 }
 0x2d0   :  { %1435 = vmatmul.mubr.msk.bf16.vlgmr.msra.gmra.mrb[0].mxu1 %vm224_vm5, %v195_v37  ;;  %1447 = vmatpush3.bf16.msra.mxu0 %v1747_v27 }
 0x2d1   :  { %1448 = vmatprep.subr.bf16.mxu0 %v1667_v0  ;;  %1459 = vmatpush3.bf16.msra.mxu1 %v1696_v1 }
 0x2d2   :  { %1460 = vmatprep.subr.bf16.mxu1 %v1667_v0  ;;  %1462 = vmatprep.mubr.msk.bf16.mxu1 %vm1668_vm0, %v1667_v0 }
 0x2d3   :  { %1454 = vmatprep.mubr.msk.bf16.mxu0 %vm1668_vm0, %v1667_v0 }
 0x2d4   :  { %1449 = vmatpush3.bf16.msra.mxu0 %v1753_v28 }
 0x2d5   :  { %1450 = vmatprep.subr.bf16.mxu0 %v1667_v0  ;;  %1461 = vmatpush3.bf16.msra.mxu1 %v1705_v3 }
 0x2d6   :  { %1466 = vmatprep.subr.bf16.mxu1 %v1667_v0 }
 0x2d8   :  { %1451 = vmatpush3.bf16.msra.mxu0 %v1760_v29 }
 0x2d9   :  { %1452 = vmatprep.subr.bf16.mxu0 %v1667_v0 }
 0x2dc   :  { %1453 = vmatpush3.bf16.msra.mxu0 %v1768_v31 }
 0x2dd   :  { %1478 = vmatprep.subr.bf16.mxu0 %v1667_v0 }
 0x3a2   :  { %v325_v42 = vpop.f32.mrb[4].mxu0 }
 0x3a3   :  { %v331_v43 = vadd.f32 %v325_v42, %v100_v40  ;;  %v261_v44 = vpop.f32.mrb[0].mxu1  ;;  %v1444_v45 = vpop.f32.mrb[5].mxu0 }
 0x3a4   :  { %v262_v46 = vadd.f32 %v1801_v41, %v261_v44  ;;  %v1436_v47 = vpop.f32.mrb[1].mxu1  ;;  %v328_v48 = vpop.f32.mrb[6].mxu0 }
 0x3a5   :  { %1605 = vtanh.f32 %v331_v43  ;;  %v264_v49 = vpop.f32.mrb[2].mxu1  ;;  %v1445_v50 = vpop.f32.mrb[7].mxu0 }
 0x3a6   :  { %1607 = vtanh.f32 %v262_v46  ;;  %v1437_v51 = vpop.f32.mrb[3].mxu1 }
 0x3af   :  { %v1606_v52 = vpop.eup %1605 }
 0x3b0   :  { %v1608_v53 = vpop.eup %1607  ;;  %v333_v54 = vmul.f32 0.5, %v1606_v52 }
 0x3b1   :  { %v268_v55 = vmul.f32 0.5, %v1608_v53 }
 0x3b2   :  { %v334_v56 = vadd.f32 0.5, %v333_v54 }
 0x3b3   :  { %v269_v57 = vadd.f32 0.5, %v268_v55 }
 0x3b4   :  { %v335_v58 = vsel %vm1733_vm3, %v1606_v52, %v334_v56 }
 0x3b5   :  { %338 = vrot.lane.b32.xlu1 %v335_v58, %s1670_s22  ;;  %v270_v59 = vsel %vm1733_vm3, %v1608_v53, %v269_v57  ;;  %v336_v2 = vmul.f32 %v335_v58, %v1741_v26 }
 0x3b6   :  { %273 = vrot.lane.b32.xlu0 %v270_v59, %s1670_s22  ;;  %v271_v6 = vmul.f32 0.0, %v270_v59 }
 0x427   :  { %v339_v60 = vpop.permute.xlu1 %338 }
 0x428   :  { %v341_v61 = vmul.f32 %v339_v60, %v335_v58  ;;  %v274_v62 = vpop.permute.xlu0 %273 }
 0x429   :  { %v276_v63 = vmul.f32 %v274_v62, %v270_v59 }
 0x42a   :  { %343 = vrot.lane.b32.xlu1 %v341_v61, %s1671_s23 }
 0x42b   :  { %278 = vrot.lane.b32.xlu0 %v276_v63, %s1671_s23 }
 0x49c   :  { %v344_v4 = vpop.permute.xlu1 %343 }
 0x49d   :  { %v1813_v7 = vadd.f32 %v344_v4, %v336_v2  ;;  %v279_v9 = vpop.permute.xlu0 %278 }
 0x49e   :  { %v1815_v10 = vadd.f32 %v279_v9, %v271_v6  ;;  %v38_v9 = vld [vmem:[%s2106_s0 + $0x18] sm:$0xff] }
 0x49f   :  { %1609 = vtanh.f32 %v1813_v7 }
 0x4a0   :  { %1611 = vtanh.f32 %v1815_v10 }
 0x4a9   :  { %v1610_v11 = vpop.eup %1609 }
 0x4aa   :  { %v1612_v12 = vpop.eup %1611  ;;  %349 = vrot.lane.b32.xlu1 %v1610_v11, %s1670_s22 }
 0x4ab   :  { %284 = vrot.lane.b32.xlu0 %v1612_v12, %s1670_s22 }
 0x51c   :  { %v350_v13 = vpop.permute.xlu1 %349 }
 0x51d   :  { %v352_v14 = vmul.f32 %v350_v13, %v335_v58  ;;  %v285_v15 = vpop.permute.xlu0 %284 }
 0x51e   :  { %v287_v16 = vmul.f32 %v285_v15, %v270_v59 }
 0x51f   :  { %v353_v17 = vpack.c.bf16 %v352_v14, %v352_v14 }
 0x520   :  { %v288_v18 = vpack.c.bf16 %v287_v16, %v287_v16 }
 0x521   :  { %355 = vrot.lane.b32.xlu0 %v353_v17, %s1671_s23 }
 0x522   :  { %358 = vrot.lane.b32.xlu1 %v288_v18, %s1670_s22 }
 0x525   :  { %55 = vperm.xlu0 %1591, %v37_v20  }
 0x593   :  { %v356_v21 = vpop.permute.xlu0 %355 }
 0x594   :  { %1463 = vmatmul.mubr.msk.bf16.vlgmr.msra.gmra.mrb[4].mxu1 %vm124_vm4, %v356_v21  ;;  %v359_v22 = vpop.permute.xlu1 %358 }
 0x595   :  { %v362_v23 = vsel %vm124_vm4, %v356_v21, %v359_v22  ;;  %1467 = vmatpush3.bf16.msra.mxu1 %v1747_v27  ;;  %1474 = vmatprep.mubr.msk.bf16.mxu1 %vm1668_vm0, %v1667_v0 }
 0x596   :  { %1455 = vmatmul.mubr.msk.bf16.vlgmr.msra.gmra.mrb[8].mxu0 %vm224_vm5, %v362_v23  ;;  %1468 = vmatprep.subr.bf16.mxu1 %v1667_v0 }
 0x597   :  { %1479 = vmatpush3.bf16.msra.mxu0 %v1696_v1  ;;  %1482 = vmatprep.mubr.msk.bf16.mxu0 %vm1668_vm0, %v1667_v0 }
 0x598   :  { %1480 = vmatprep.subr.bf16.mxu0 %v1667_v0 }
 0x599   :  { %1469 = vmatpush3.bf16.msra.mxu1 %v1753_v28 }
 0x59a   :  { %1470 = vmatprep.subr.bf16.mxu1 %v1667_v0 }
 0x59b   :  { %1481 = vmatpush3.bf16.msra.mxu0 %v1705_v3 }
 0x59c   :  { %1486 = vmatprep.subr.bf16.mxu0 %v1667_v0 }
 0x59d   :  { %1471 = vmatpush3.bf16.msra.mxu1 %v1760_v29 }
 0x59e   :  { %1472 = vmatprep.subr.bf16.mxu1 %v1667_v0 }
 0x5a1   :  { %1473 = vmatpush3.bf16.msra.mxu1 %v1768_v31 }
 0x5a2   :  { %1498 = vmatprep.subr.bf16.mxu1 %v1667_v0 }
 0x5a4   :  { %v56_v24 = vpop.permute.xlu0 %55 }
 0x5a5   :  { %v89_v25 = vmul.f32 %v1724_v5, %v56_v24 }
 0x5a7   :  { %v101_v26 = vadd.f32 %v1730_v8, %v89_v25 }
 0x667   :  { %v463_v30 = vpop.f32.mrb[4].mxu1 }
 0x668   :  { %v469_v32 = vadd.f32 %v463_v30, %v101_v26  ;;  %v1464_v33 = vpop.f32.mrb[5].mxu1 }
 0x669   :  { %v399_v34 = vpop.f32.mrb[8].mxu0  ;;  %v466_v35 = vpop.f32.mrb[6].mxu1 }
 0x66a   :  { %1613 = vtanh.f32 %v469_v32  ;;  %v400_v36 = vadd.f32 %v1801_v41, %v399_v34  ;;  %v1456_v37 = vpop.f32.mrb[9].mxu0  ;;  %v1465_v38 = vpop.f32.mrb[7].mxu1 }
 0x66b   :  { %v402_v39 = vpop.f32.mrb[10].mxu0 }
 0x66c   :  { %1615 = vtanh.f32 %v400_v36  ;;  %v1457_v40 = vpop.f32.mrb[11].mxu0 }
 0x674   :  { %v1614_v42 = vpop.eup %1613 }
 0x675   :  { %v471_v43 = vmul.f32 0.5, %v1614_v42 }
 0x676   :  { %v1616_v44 = vpop.eup %1615 }
 0x677   :  { %v472_v45 = vadd.f32 0.5, %v471_v43  ;;  %v406_v46 = vmul.f32 0.5, %v1616_v44 }
 0x679   :  { %v473_v47 = vsel %vm1733_vm3, %v1614_v42, %v472_v45  ;;  %v407_v48 = vadd.f32 0.5, %v406_v46 }
 0x67a   :  { %476 = vrot.lane.b32.xlu0 %v473_v47, %s1670_s22  ;;  %v474_v54 = vmul.f32 %v473_v47, %v1813_v7 }
 0x67b   :  { %v408_v49 = vsel %vm1733_vm3, %v1616_v44, %v407_v48 }
 0x67c   :  { %411 = vrot.lane.b32.xlu1 %v408_v49, %s1670_s22  ;;  %v409_v57 = vmul.f32 %v408_v49, %v1815_v10 }
 0x6ec   :  { %v477_v50 = vpop.permute.xlu0 %476 }
 0x6ed   :  { %v479_v51 = vmul.f32 %v477_v50, %v473_v47 }
 0x6ee   :  { %v412_v52 = vpop.permute.xlu1 %411 }
 0x6ef   :  { %v414_v53 = vmul.f32 %v412_v52, %v408_v49  ;;  %481 = vrot.lane.b32.xlu0 %v479_v51, %s1671_s23 }
 0x6f1   :  { %416 = vrot.lane.b32.xlu1 %v414_v53, %s1671_s23 }
 0x761   :  { %v482_v55 = vpop.permute.xlu0 %481 }
 0x762   :  { %v1857_v56 = vadd.f32 %v482_v55, %v474_v54 }
 0x763   :  { %v417_v58 = vpop.permute.xlu1 %416 }
 0x764   :  { %1617 = vtanh.f32 %v1857_v56  ;;  %v1861_v59 = vadd.f32 %v417_v58, %v409_v57  ;;  %v39_v58 = vld [vmem:[%s2106_s0 + $0x20] sm:$0xff] }
 0x766   :  { %1619 = vtanh.f32 %v1861_v59 }
 0x76e   :  { %v1618_v60 = vpop.eup %1617 }
 0x76f   :  { %487 = vrot.lane.b32.xlu0 %v1618_v60, %s1670_s22 }
 0x770   :  { %v1620_v61 = vpop.eup %1619 }
 0x771   :  { %422 = vrot.lane.b32.xlu1 %v1620_v61, %s1670_s22 }
 0x7e1   :  { %v488_v62 = vpop.permute.xlu0 %487 }
 0x7e2   :  { %v490_v63 = vmul.f32 %v488_v62, %v473_v47 }
 0x7e3   :  { %v423_v2 = vpop.permute.xlu1 %422 }
 0x7e4   :  { %v491_v4 = vpack.c.bf16 %v490_v63, %v490_v63  ;;  %v425_v6 = vmul.f32 %v423_v2, %v408_v49 }
 0x7e6   :  { %v426_v7 = vpack.c.bf16 %v425_v6, %v425_v6  ;;  %493 = vrot.lane.b32.xlu1 %v491_v4, %s1671_s23 }
 0x7e8   :  { %496 = vrot.lane.b32.xlu0 %v426_v7, %s1670_s22 }
 0x7ea   :  { %60 = vperm.xlu1 %1592, %v38_v9  }
 0x858   :  { %v494_v10 = vpop.permute.xlu1 %493 }
 0x859   :  { %1483 = vmatmul.mubr.msk.bf16.vlgmr.msra.gmra.mrb[12].mxu0 %vm124_vm4, %v494_v10 }
 0x85a   :  { %v497_v11 = vpop.permute.xlu0 %496  ;;  %1487 = vmatpush3.bf16.msra.mxu0 %v1747_v27  ;;  %1494 = vmatprep.mubr.msk.bf16.mxu0 %vm1668_vm0, %v1667_v0 }
 0x85b   :  { %v500_v12 = vsel %vm124_vm4, %v494_v10, %v497_v11  ;;  %1488 = vmatprep.subr.bf16.mxu0 %v1667_v0 }
 0x85c   :  { %1475 = vmatmul.mubr.msk.bf16.vlgmr.msra.gmra.mrb[8].mxu1 %vm224_vm5, %v500_v12 }
 0x85d   :  { %1499 = vmatpush3.bf16.msra.mxu1 %v1696_v1  ;;  %1502 = vmatprep.mubr.msk.bf16.mxu1 %vm1668_vm0, %v1667_v0 }
 0x85e   :  { %1489 = vmatpush3.bf16.msra.mxu0 %v1753_v28  ;;  %1500 = vmatprep.subr.bf16.mxu1 %v1667_v0 }
 0x85f   :  { %1490 = vmatprep.subr.bf16.mxu0 %v1667_v0 }
 0x861   :  { %1501 = vmatpush3.bf16.msra.mxu1 %v1705_v3 }
 0x862   :  { %1491 = vmatpush3.bf16.msra.mxu0 %v1760_v29  ;;  %1506 = vmatprep.subr.bf16.mxu1 %v1667_v0 }
 0x863   :  { %1492 = vmatprep.subr.bf16.mxu0 %v1667_v0 }
 0x866   :  { %1493 = vmatpush3.bf16.msra.mxu0 %v1768_v31 }
 0x867   :  { %1518 = vmatprep.subr.bf16.mxu0 %v1667_v0 }
 0x869   :  { %v61_v13 = vpop.permute.xlu1 %60 }
 0x86a   :  { %v90_v14 = vmul.f32 %v1724_v5, %v61_v13 }
 0x86c   :  { %v102_v15 = vadd.f32 %v1730_v8, %v90_v14 }
 0x92c   :  { %v601_v16 = vpop.f32.mrb[12].mxu0 }
 0x92d   :  { %v607_v17 = vadd.f32 %v601_v16, %v102_v15  ;;  %v1484_v18 = vpop.f32.mrb[13].mxu0 }
 0x92e   :  { %v604_v20 = vpop.f32.mrb[14].mxu0 }
 0x92f   :  { %1621 = vtanh.f32 %v607_v17  ;;  %v537_v21 = vpop.f32.mrb[8].mxu1  ;;  %v1485_v22 = vpop.f32.mrb[15].mxu0 }
 0x930   :  { %v538_v23 = vadd.f32 %v1801_v41, %v537_v21  ;;  %v1476_v24 = vpop.f32.mrb[9].mxu1 }
 0x931   :  { %v540_v25 = vpop.f32.mrb[10].mxu1 }
 0x932   :  { %1623 = vtanh.f32 %v538_v23  ;;  %v1477_v26 = vpop.f32.mrb[11].mxu1 }
 0x939   :  { %v1622_v30 = vpop.eup %1621 }
 0x93a   :  { %v609_v32 = vmul.f32 0.5, %v1622_v30 }
 0x93c   :  { %v1624_v33 = vpop.eup %1623  ;;  %v610_v34 = vadd.f32 0.5, %v609_v32 }
 0x93d   :  { %v544_v35 = vmul.f32 0.5, %v1624_v33 }
 0x93e   :  { %v611_v36 = vsel %vm1733_vm3, %v1622_v30, %v610_v34 }
 0x93f   :  { %614 = vrot.lane.b32.xlu1 %v611_v36, %s1670_s22  ;;  %v545_v37 = vadd.f32 0.5, %v544_v35  ;;  %v612_v44 = vmul.f32 %v611_v36, %v1857_v56 }
 0x941   :  { %v546_v38 = vsel %vm1733_vm3, %v1624_v33, %v545_v37 }
 0x942   :  { %549 = vrot.lane.b32.xlu0 %v546_v38, %s1670_s22  ;;  %v547_v47 = vmul.f32 %v546_v38, %v1861_v59 }
 0x9b1   :  { %v615_v39 = vpop.permute.xlu1 %614 }
 0x9b2   :  { %v617_v40 = vmul.f32 %v615_v39, %v611_v36 }
 0x9b4   :  { %v550_v42 = vpop.permute.xlu0 %549  ;;  %619 = vrot.lane.b32.xlu1 %v617_v40, %s1671_s23 }
 0x9b5   :  { %v552_v43 = vmul.f32 %v550_v42, %v546_v38 }
 0x9b7   :  { %554 = vrot.lane.b32.xlu0 %v552_v43, %s1671_s23 }
 0xa26   :  { %v620_v45 = vpop.permute.xlu1 %619 }
 0xa27   :  { %v1902_v46 = vadd.f32 %v620_v45, %v612_v44 }
 0xa29   :  { %1625 = vtanh.f32 %v1902_v46  ;;  %v555_v48 = vpop.permute.xlu0 %554 }
 0xa2a   :  { %v1906_v49 = vadd.f32 %v555_v48, %v547_v47  ;;  %v40_v47 = vld [vmem:[%s2106_s0 + $0x28] sm:$0xff] }
 0xa2c   :  { %1627 = vtanh.f32 %v1906_v49 }
 0xa33   :  { %v1626_v50 = vpop.eup %1625 }
 0xa34   :  { %625 = vrot.lane.b32.xlu1 %v1626_v50, %s1670_s22 }
 0xa36   :  { %v1628_v51 = vpop.eup %1627 }
 0xa37   :  { %560 = vrot.lane.b32.xlu0 %v1628_v51, %s1670_s22 }
 0xaa6   :  { %v626_v52 = vpop.permute.xlu1 %625 }
 0xaa7   :  { %v628_v53 = vmul.f32 %v626_v52, %v611_v36 }
 0xaa9   :  { %v629_v54 = vpack.c.bf16 %v628_v53, %v628_v53  ;;  %v561_v55 = vpop.permute.xlu0 %560 }
 0xaaa   :  { %v563_v56 = vmul.f32 %v561_v55, %v546_v38 }
 0xaab   :  { %631 = vrot.lane.b32.xlu0 %v629_v54, %s1671_s23 }
 0xaac   :  { %v564_v57 = vpack.c.bf16 %v563_v56, %v563_v56 }
 0xaae   :  { %634 = vrot.lane.b32.xlu1 %v564_v57, %s1670_s22 }
 0xaaf   :  { %65 = vperm.xlu0 %1591, %v39_v58  }
 0xb1d   :  { %v632_v59 = vpop.permute.xlu0 %631 }
 0xb1e   :  { %1503 = vmatmul.mubr.msk.bf16.vlgmr.msra.gmra.mrb[12].mxu1 %vm124_vm4, %v632_v59 }
 0xb1f   :  { %1507 = vmatpush3.bf16.msra.mxu1 %v1747_v27  ;;  %1514 = vmatprep.mubr.msk.bf16.mxu1 %vm1668_vm0, %v1667_v0 }
 0xb20   :  { %v635_v60 = vpop.permute.xlu1 %634  ;;  %1508 = vmatprep.subr.bf16.mxu1 %v1667_v0 }
 0xb21   :  { %v638_v61 = vsel %vm124_vm4, %v632_v59, %v635_v60 }
 0xb22   :  { %1495 = vmatmul.mubr.msk.bf16.vlgmr.msra.gmra.mrb[16].mxu0 %vm224_vm5, %v638_v61 }
 0xb23   :  { %1519 = vmatpush3.bf16.msra.mxu0 %v1696_v1  ;;  %1509 = vmatpush3.bf16.msra.mxu1 %v1753_v28 }
 0xb24   :  { %1520 = vmatprep.subr.bf16.mxu0 %v1667_v0  ;;  %1510 = vmatprep.subr.bf16.mxu1 %v1667_v0 }
 0xb25   :  { %1522 = vmatprep.mubr.msk.bf16.mxu0 %vm1668_vm0, %v1667_v0 }
 0xb27   :  { %1521 = vmatpush3.bf16.msra.mxu0 %v1705_v3  ;;  %1511 = vmatpush3.bf16.msra.mxu1 %v1760_v29 }
 0xb28   :  { %1512 = vmatprep.subr.bf16.mxu1 %v1667_v0  ;;  %1526 = vmatprep.subr.bf16.mxu0 %v1667_v0 }
 0xb2b   :  { %1513 = vmatpush3.bf16.msra.mxu1 %v1768_v31 }
 0xb2c   :  { %1538 = vmatprep.subr.bf16.mxu1 %v1667_v0 }
 0xb2e   :  { %v66_v62 = vpop.permute.xlu0 %65 }
 0xb2f   :  { %v91_v63 = vmul.f32 %v1724_v5, %v66_v62 }
 0xb31   :  { %v103_v2 = vadd.f32 %v1730_v8, %v91_v63 }
 0xbf1   :  { %v739_v4 = vpop.f32.mrb[12].mxu1 }
 0xbf2   :  { %v745_v6 = vadd.f32 %v739_v4, %v103_v2  ;;  %v1504_v7 = vpop.f32.mrb[13].mxu1 }
 0xbf3   :  { %v742_v9 = vpop.f32.mrb[14].mxu1 }
 0xbf4   :  { %1629 = vtanh.f32 %v745_v6  ;;  %v1505_v10 = vpop.f32.mrb[15].mxu1 }
 0xbf5   :  { %v675_v11 = vpop.f32.mrb[16].mxu0 }
 0xbf6   :  { %v676_v12 = vadd.f32 %v1801_v41, %v675_v11  ;;  %v1496_v13 = vpop.f32.mrb[17].mxu0 }
 0xbf7   :  { %v678_v14 = vpop.f32.mrb[18].mxu0 }
 0xbf8   :  { %1631 = vtanh.f32 %v676_v12  ;;  %v1497_v15 = vpop.f32.mrb[19].mxu0 }
 0xbfe   :  { %v1630_v16 = vpop.eup %1629 }
 0xbff   :  { %v747_v17 = vmul.f32 0.5, %v1630_v16 }
 0xc01   :  { %v748_v18 = vadd.f32 0.5, %v747_v17 }
 0xc02   :  { %v1632_v20 = vpop.eup %1631 }
 0xc03   :  { %v749_v21 = vsel %vm1733_vm3, %v1630_v16, %v748_v18  ;;  %v682_v22 = vmul.f32 0.5, %v1632_v20 }
 0xc04   :  { %752 = vrot.lane.b32.xlu0 %v749_v21, %s1670_s22  ;;  %v750_v33 = vmul.f32 %v749_v21, %v1902_v46 }
 0xc05   :  { %v683_v23 = vadd.f32 0.5, %v682_v22 }
 0xc07   :  { %v684_v24 = vsel %vm1733_vm3, %v1632_v20, %v683_v23 }
 0xc08   :  { %687 = vrot.lane.b32.xlu1 %v684_v24, %s1670_s22  ;;  %v685_v36 = vmul.f32 %v684_v24, %v1906_v49 }
 0xc76   :  { %v753_v25 = vpop.permute.xlu0 %752 }
 0xc77   :  { %v755_v26 = vmul.f32 %v753_v25, %v749_v21 }
 0xc79   :  { %757 = vrot.lane.b32.xlu0 %v755_v26, %s1671_s23 }
 0xc7a   :  { %v688_v30 = vpop.permute.xlu1 %687 }
 0xc7b   :  { %v690_v32 = vmul.f32 %v688_v30, %v684_v24 }
 0xc7d   :  { %692 = vrot.lane.b32.xlu1 %v690_v32, %s1671_s23 }
 0xceb   :  { %v758_v34 = vpop.permute.xlu0 %757 }
 0xcec   :  { %v1947_v35 = vadd.f32 %v758_v34, %v750_v33 }
 0xcee   :  { %1633 = vtanh.f32 %v1947_v35 }
 0xcef   :  { %v693_v37 = vpop.permute.xlu1 %692 }
 0xcf0   :  { %v1951_v38 = vadd.f32 %v693_v37, %v685_v36  ;;  %v41_v36 = vld [vmem:[%s2106_s0 + $0x30] sm:$0xff] }
 0xcf2   :  { %1635 = vtanh.f32 %v1951_v38 }
 0xcf8   :  { %v1634_v39 = vpop.eup %1633 }
 0xcf9   :  { %763 = vrot.lane.b32.xlu0 %v1634_v39, %s1670_s22 }
 0xcfc   :  { %v1636_v40 = vpop.eup %1635 }
 0xcfd   :  { %698 = vrot.lane.b32.xlu1 %v1636_v40, %s1670_s22 }
 0xd6b   :  { %v764_v42 = vpop.permute.xlu0 %763 }
 0xd6c   :  { %v766_v43 = vmul.f32 %v764_v42, %v749_v21 }
 0xd6e   :  { %v767_v44 = vpack.c.bf16 %v766_v43, %v766_v43 }
 0xd6f   :  { %v699_v45 = vpop.permute.xlu1 %698 }
 0xd70   :  { %v701_v46 = vmul.f32 %v699_v45, %v684_v24  ;;  %769 = vrot.lane.b32.xlu1 %v767_v44, %s1671_s23 }
 0xd72   :  { %v702_v48 = vpack.c.bf16 %v701_v46, %v701_v46 }
 0xd74   :  { %70 = vperm.xlu1 %1592, %v40_v47   ;;  %772 = vrot.lane.b32.xlu0 %v702_v48, %s1670_s22 }
 0xde2   :  { %v770_v49 = vpop.permute.xlu1 %769 }
 0xde3   :  { %1523 = vmatmul.mubr.msk.bf16.vlgmr.msra.gmra.mrb[20].mxu0 %vm124_vm4, %v770_v49 }
 0xde4   :  { %1527 = vmatpush3.bf16.msra.mxu0 %v1747_v27  ;;  %1534 = vmatprep.mubr.msk.bf16.mxu0 %vm1668_vm0, %v1667_v0 }
 0xde5   :  { %1528 = vmatprep.subr.bf16.mxu0 %v1667_v0 }
 0xde6   :  { %v773_v50 = vpop.permute.xlu0 %772 }
 0xde7   :  { %v776_v51 = vsel %vm124_vm4, %v770_v49, %v773_v50 }
 0xde8   :  { %1515 = vmatmul.mubr.msk.bf16.vlgmr.msra.gmra.mrb[16].mxu1 %vm224_vm5, %v776_v51  ;;  %1529 = vmatpush3.bf16.msra.mxu0 %v1753_v28 }
 0xde9   :  { %1539 = vmatpush3.bf16.msra.mxu1 %v1696_v1  ;;  %1530 = vmatprep.subr.bf16.mxu0 %v1667_v0 }
 0xdea   :  { %1540 = vmatprep.subr.bf16.mxu1 %v1667_v0  ;;  %1542 = vmatprep.mubr.msk.bf16.mxu1 %vm1668_vm0, %v1667_v0 }
 0xdec   :  { %1531 = vmatpush3.bf16.msra.mxu0 %v1760_v29 }
 0xded   :  { %1541 = vmatpush3.bf16.msra.mxu1 %v1705_v3  ;;  %1532 = vmatprep.subr.bf16.mxu0 %v1667_v0 }
 0xdee   :  { %1546 = vmatprep.subr.bf16.mxu1 %v1667_v0 }
 0xdf0   :  { %1533 = vmatpush3.bf16.msra.mxu0 %v1768_v31 }
 0xdf1   :  { %1558 = vmatprep.subr.bf16.mxu0 %v1667_v0 }
 0xdf3   :  { %v71_v52 = vpop.permute.xlu1 %70 }
 0xdf4   :  { %v92_v53 = vmul.f32 %v1724_v5, %v71_v52 }
 0xdf6   :  { %v104_v54 = vadd.f32 %v1730_v8, %v92_v53 }
 0xeb6   :  { %v877_v55 = vpop.f32.mrb[20].mxu0 }
 0xeb7   :  { %v883_v56 = vadd.f32 %v877_v55, %v104_v54  ;;  %v1524_v57 = vpop.f32.mrb[21].mxu0 }
 0xeb8   :  { %v880_v58 = vpop.f32.mrb[22].mxu0 }
 0xeb9   :  { %1637 = vtanh.f32 %v883_v56  ;;  %v1525_v59 = vpop.f32.mrb[23].mxu0 }
 0xebb   :  { %v813_v60 = vpop.f32.mrb[16].mxu1 }
 0xebc   :  { %v814_v61 = vadd.f32 %v1801_v41, %v813_v60  ;;  %v1516_v62 = vpop.f32.mrb[17].mxu1 }
 0xebd   :  { %v816_v63 = vpop.f32.mrb[18].mxu1 }
 0xebe   :  { %1639 = vtanh.f32 %v814_v61  ;;  %v1517_v2 = vpop.f32.mrb[19].mxu1 }
 0xec3   :  { %v1638_v4 = vpop.eup %1637 }
 0xec4   :  { %v885_v6 = vmul.f32 0.5, %v1638_v4 }
 0xec6   :  { %v886_v7 = vadd.f32 0.5, %v885_v6 }
 0xec8   :  { %v1640_v9 = vpop.eup %1639  ;;  %v887_v10 = vsel %vm1733_vm3, %v1638_v4, %v886_v7 }
 0xec9   :  { %890 = vrot.lane.b32.xlu1 %v887_v10, %s1670_s22  ;;  %v820_v11 = vmul.f32 0.5, %v1640_v9  ;;  %v888_v18 = vmul.f32 %v887_v10, %v1947_v35 }
 0xecb   :  { %v821_v12 = vadd.f32 0.5, %v820_v11 }
 0xecd   :  { %v822_v13 = vsel %vm1733_vm3, %v1640_v9, %v821_v12 }
 0xece   :  { %825 = vrot.lane.b32.xlu0 %v822_v13, %s1670_s22  ;;  %v823_v22 = vmul.f32 %v822_v13, %v1951_v38 }
 0xf3b   :  { %v891_v14 = vpop.permute.xlu1 %890 }
 0xf3c   :  { %v893_v15 = vmul.f32 %v891_v14, %v887_v10 }
 0xf3e   :  { %895 = vrot.lane.b32.xlu1 %v893_v15, %s1671_s23 }
 0xf40   :  { %v826_v16 = vpop.permute.xlu0 %825 }
 0xf41   :  { %v828_v17 = vmul.f32 %v826_v16, %v822_v13 }
 0xf43   :  { %830 = vrot.lane.b32.xlu0 %v828_v17, %s1671_s23 }
 0xfb0   :  { %v896_v20 = vpop.permute.xlu1 %895 }
 0xfb1   :  { %v1992_v21 = vadd.f32 %v896_v20, %v888_v18  ;;  %v42_v18 = vld [vmem:[%s2106_s0 + $0x38] sm:$0xff] }
 0xfb3   :  { %1641 = vtanh.f32 %v1992_v21 }
 0xfb5   :  { %v831_v23 = vpop.permute.xlu0 %830 }
 0xfb6   :  { %v1996_v24 = vadd.f32 %v831_v23, %v823_v22 }
 0xfb8   :  { %1643 = vtanh.f32 %v1996_v24 }
 0xfbd   :  { %v1642_v25 = vpop.eup %1641 }
 0xfbe   :  { %901 = vrot.lane.b32.xlu1 %v1642_v25, %s1670_s22 }
 0xfc2   :  { %v1644_v26 = vpop.eup %1643 }
 0xfc3   :  { %836 = vrot.lane.b32.xlu0 %v1644_v26, %s1670_s22 }
0x1030   :  { %v902_v30 = vpop.permute.xlu1 %901 }
0x1031   :  { %v904_v32 = vmul.f32 %v902_v30, %v887_v10 }
0x1033   :  { %v905_v33 = vpack.c.bf16 %v904_v32, %v904_v32 }
0x1035   :  { %v837_v34 = vpop.permute.xlu0 %836  ;;  %907 = vrot.lane.b32.xlu0 %v905_v33, %s1671_s23 }
0x1036   :  { %v839_v35 = vmul.f32 %v837_v34, %v822_v13 }
0x1038   :  { %v840_v37 = vpack.c.bf16 %v839_v35, %v839_v35 }
0x1039   :  { %75 = vperm.xlu0 %1591, %v41_v36  }
0x103a   :  { %910 = vrot.lane.b32.xlu1 %v840_v37, %s1670_s22 }
0x10a7   :  { %v908_v38 = vpop.permute.xlu0 %907 }
0x10a8   :  { %1543 = vmatmul.mubr.msk.bf16.vlgmr.msra.gmra.mrb[20].mxu1 %vm124_vm4, %v908_v38 }
0x10a9   :  { %1547 = vmatpush3.bf16.msra.mxu1 %v1747_v27  ;;  %1554 = vmatprep.mubr.msk.bf16.mxu1 %vm1668_vm0, %v1667_v0 }
0x10aa   :  { %1548 = vmatprep.subr.bf16.mxu1 %v1667_v0 }
0x10ac   :  { %v911_v39 = vpop.permute.xlu1 %910 }
0x10ad   :  { %v914_v40 = vsel %vm124_vm4, %v908_v38, %v911_v39  ;;  %1549 = vmatpush3.bf16.msra.mxu1 %v1753_v28 }
0x10ae   :  { %1535 = vmatmul.mubr.msk.bf16.vlgmr.msra.gmra.mrb[24].mxu0 %vm224_vm5, %v914_v40  ;;  %1550 = vmatprep.subr.bf16.mxu1 %v1667_v0 }
0x10af   :  { %1559 = vmatpush3.bf16.msra.mxu0 %v1696_v1  ;;  %1562 = vmatprep.mubr.msk.bf16.mxu0 %vm1668_vm0, %v1667_v0 }
0x10b0   :  { %1560 = vmatprep.subr.bf16.mxu0 %v1667_v0 }
0x10b1   :  { %1551 = vmatpush3.bf16.msra.mxu1 %v1760_v29 }
0x10b2   :  { %1552 = vmatprep.subr.bf16.mxu1 %v1667_v0 }
0x10b3   :  { %1561 = vmatpush3.bf16.msra.mxu0 %v1705_v3 }
0x10b4   :  { %1566 = vmatprep.subr.bf16.mxu0 %v1667_v0 }
0x10b5   :  { %1553 = vmatpush3.bf16.msra.mxu1 %v1768_v31 }
0x10b6   :  { %1578 = vmatprep.subr.bf16.mxu1 %v1667_v0 }
0x10b8   :  { %v76_v42 = vpop.permute.xlu0 %75 }
0x10b9   :  { %v93_v1 = vmul.f32 %v1724_v5, %v76_v42 }
0x10bb   :  { %v105_v43 = vadd.f32 %v1730_v8, %v93_v1 }
0x117b   :  { %v1015_v44 = vpop.f32.mrb[20].mxu1 }
0x117c   :  { %v1021_v45 = vadd.f32 %v1015_v44, %v105_v43  ;;  %v1544_v46 = vpop.f32.mrb[21].mxu1 }
0x117d   :  { %v1018_v47 = vpop.f32.mrb[22].mxu1 }
0x117e   :  { %1645 = vtanh.f32 %v1021_v45  ;;  %v1545_v48 = vpop.f32.mrb[23].mxu1 }
0x1181   :  { %v951_v49 = vpop.f32.mrb[24].mxu0 }
0x1182   :  { %v952_v3 = vadd.f32 %v1801_v41, %v951_v49  ;;  %v1536_v50 = vpop.f32.mrb[25].mxu0 }
0x1183   :  { %v954_v51 = vpop.f32.mrb[26].mxu0 }
0x1184   :  { %1647 = vtanh.f32 %v952_v3  ;;  %v1537_v52 = vpop.f32.mrb[27].mxu0 }
0x1188   :  { %v1646_v53 = vpop.eup %1645 }
0x1189   :  { %v1023_v54 = vmul.f32 0.5, %v1646_v53 }
0x118b   :  { %v1024_v55 = vadd.f32 0.5, %v1023_v54 }
0x118d   :  { %v1025_v56 = vsel %vm1733_vm3, %v1646_v53, %v1024_v55 }
0x118e   :  { %v1648_v57 = vpop.eup %1647  ;;  %1028 = vrot.lane.b32.xlu0 %v1025_v56, %s1670_s22  ;;  %v1026_v4 = vmul.f32 %v1025_v56, %v1992_v21 }
0x118f   :  { %v958_v58 = vmul.f32 0.5, %v1648_v57 }
0x1191   :  { %v959_v59 = vadd.f32 0.5, %v958_v58 }
0x1193   :  { %v960_v60 = vsel %vm1733_vm3, %v1648_v57, %v959_v59 }
0x1194   :  { %963 = vrot.lane.b32.xlu1 %v960_v60, %s1670_s22  ;;  %v961_v9 = vmul.f32 %v960_v60, %v1996_v24 }
0x1200   :  { %v1029_v61 = vpop.permute.xlu0 %1028 }
0x1201   :  { %v1031_v62 = vmul.f32 %v1029_v61, %v1025_v56 }
0x1203   :  { %1033 = vrot.lane.b32.xlu0 %v1031_v62, %s1671_s23 }
0x1206   :  { %v964_v63 = vpop.permute.xlu1 %963 }
0x1207   :  { %v966_v2 = vmul.f32 %v964_v63, %v960_v60 }
0x1209   :  { %968 = vrot.lane.b32.xlu1 %v966_v2, %s1671_s23 }
0x1275   :  { %v1034_v6 = vpop.permute.xlu0 %1033 }
0x1276   :  { %v2037_v7 = vadd.f32 %v1034_v6, %v1026_v4 }
0x1278   :  { %1649 = vtanh.f32 %v2037_v7 }
0x127b   :  { %v969_v10 = vpop.permute.xlu1 %968 }
0x127c   :  { %v2041_v11 = vadd.f32 %v969_v10, %v961_v9 }
0x127e   :  { %1651 = vtanh.f32 %v2041_v11 }
0x1282   :  { %v1650_v12 = vpop.eup %1649 }
0x1283   :  { %1039 = vrot.lane.b32.xlu0 %v1650_v12, %s1670_s22 }
0x1288   :  { %v1652_v13 = vpop.eup %1651 }
0x1289   :  { %974 = vrot.lane.b32.xlu1 %v1652_v13, %s1670_s22 }
0x12f5   :  { %v1040_v14 = vpop.permute.xlu0 %1039 }
0x12f6   :  { %v1042_v15 = vmul.f32 %v1040_v14, %v1025_v56 }
0x12f8   :  { %v1043_v16 = vpack.c.bf16 %v1042_v15, %v1042_v15 }
0x12fa   :  { %1045 = vrot.lane.b32.xlu1 %v1043_v16, %s1671_s23 }
0x12fb   :  { %v975_v17 = vpop.permute.xlu1 %974 }
0x12fc   :  { %v977_v20 = vmul.f32 %v975_v17, %v960_v60 }
0x12fe   :  { %v978_v21 = vpack.c.bf16 %v977_v20, %v977_v20  ;;  %80 = vperm.xlu1 %1592, %v42_v18  }
0x1300   :  { %1048 = vrot.lane.b32.xlu0 %v978_v21, %s1670_s22 }
0x136c   :  { %v1046_v22 = vpop.permute.xlu1 %1045 }
0x136d   :  { %1563 = vmatmul.mubr.msk.bf16.vlgmr.msra.gmra.mrb[28].mxu0 %vm124_vm4, %v1046_v22 }
0x136e   :  { %1567 = vmatpush3.bf16.msra.mxu0 %v1747_v27  ;;  %1574 = vmatprep.mubr.msk.bf16.mxu0 %vm1668_vm0, %v1667_v0 }
0x136f   :  { %1568 = vmatprep.subr.bf16.mxu0 %v1667_v0 }
0x1372   :  { %v1049_v23 = vpop.permute.xlu0 %1048  ;;  %1569 = vmatpush3.bf16.msra.mxu0 %v1753_v28 }
0x1373   :  { %v1052_v24 = vsel %vm124_vm4, %v1046_v22, %v1049_v23  ;;  %1570 = vmatprep.subr.bf16.mxu0 %v1667_v0 }
0x1374   :  { %1555 = vmatmul.mubr.msk.bf16.vlgmr.msra.gmra.mrb[24].mxu1 %vm224_vm5, %v1052_v24 }
0x1375   :  { %1582 = vmatprep.mubr.msk.bf16.mxu1 %vm1668_vm0, %v1667_v0 }
0x1376   :  { %1571 = vmatpush3.bf16.msra.mxu0 %v1760_v29 }
0x1377   :  { %1572 = vmatprep.subr.bf16.mxu0 %v1667_v0 }
0x137a   :  { %1573 = vmatpush3.bf16.msra.mxu0 %v1768_v31 }
0x137d   :  { %v81_v27 = vpop.permute.xlu1 %80 }
0x137e   :  { %v94_v25 = vmul.f32 %v1724_v5, %v81_v27  ;;  %v1347_v27 = vld [vmem:[%s2107_s2 + $0x3] ss:$0 sm:$0xff] }
0x1380   :  { %v106_v28 = vadd.f32 %v1730_v8, %v94_v25 }
0x1440   :  { %v1153_v26 = vpop.f32.mrb[28].mxu0 }
0x1441   :  { %v1159_v30 = vadd.f32 %v1153_v26, %v106_v28  ;;  %v1564_v32 = vpop.f32.mrb[29].mxu0 }
0x1442   :  { %v1156_v33 = vpop.f32.mrb[30].mxu0 }
0x1443   :  { %1653 = vtanh.f32 %v1159_v30  ;;  %v1565_v34 = vpop.f32.mrb[31].mxu0 }
0x1447   :  { %v1089_v35 = vpop.f32.mrb[24].mxu1 }
0x1448   :  { %v1090_v36 = vadd.f32 %v1801_v41, %v1089_v35  ;;  %v1556_v37 = vpop.f32.mrb[25].mxu1 }
0x1449   :  { %v1092_v29 = vpop.f32.mrb[26].mxu1 }
0x144a   :  { %1655 = vtanh.f32 %v1090_v36  ;;  %v1557_v38 = vpop.f32.mrb[27].mxu1 }
0x144d   :  { %v1654_v39 = vpop.eup %1653 }
0x144e   :  { %v1161_v31 = vmul.f32 0.5, %v1654_v39 }
0x1450   :  { %v1162_v40 = vadd.f32 0.5, %v1161_v31 }
0x1452   :  { %v1163_v5 = vsel %vm1733_vm3, %v1654_v39, %v1162_v40 }
0x1453   :  { %1166 = vrot.lane.b32.xlu1 %v1163_v5, %s1670_s22  ;;  %v1164_v48 = vmul.f32 %v1163_v5, %v2037_v7 }
0x1454   :  { %v1656_v8 = vpop.eup %1655 }
0x1455   :  { %v1096_v42 = vmul.f32 0.5, %v1656_v8 }
0x1457   :  { %v1097_v1 = vadd.f32 0.5, %v1096_v42 }
0x1459   :  { %v1098_v43 = vsel %vm1733_vm3, %v1656_v8, %v1097_v1 }
0x145a   :  { %1101 = vrot.lane.b32.xlu0 %v1098_v43, %s1670_s22  ;;  %v1099_v50 = vmul.f32 %v1098_v43, %v2041_v11 }
0x14c5   :  { %v1167_v44 = vpop.permute.xlu1 %1166 }
0x14c6   :  { %v1169_v45 = vmul.f32 %v1167_v44, %v1163_v5 }
0x14c8   :  { %1171 = vrot.lane.b32.xlu1 %v1169_v45, %s1671_s23 }
0x14cc   :  { %v1102_v46 = vpop.permute.xlu0 %1101 }
0x14cd   :  { %v1104_v47 = vmul.f32 %v1102_v46, %v1098_v43 }
0x14cf   :  { %1106 = vrot.lane.b32.xlu0 %v1104_v47, %s1671_s23 }
0x153a   :  { %v1172_v49 = vpop.permute.xlu1 %1171 }
0x153b   :  { %v1174_v3 = vadd.f32 %v1172_v49, %v1164_v48 }
0x153d   :  { %1657 = vtanh.f32 %v1174_v3 }
0x1541   :  { %v1107_v51 = vpop.permute.xlu0 %1106 }
0x1542   :  { %v1109_v52 = vadd.f32 %v1107_v51, %v1099_v50 }
0x1544   :  { %1659 = vtanh.f32 %v1109_v52 }
0x1547   :  { %v1658_v53 = vpop.eup %1657 }
0x1548   :  { %1177 = vrot.lane.b32.xlu1 %v1658_v53, %s1670_s22 }
0x154e   :  { %v1660_v54 = vpop.eup %1659 }
0x154f   :  { %1112 = vrot.lane.b32.xlu0 %v1660_v54, %s1670_s22 }
0x15ba   :  { %v1178_v55 = vpop.permute.xlu1 %1177 }
0x15bb   :  { %v1180_v56 = vmul.f32 %v1178_v55, %v1163_v5 }
0x15bd   :  { %v1181_v57 = vpack.c.bf16 %v1180_v56, %v1180_v56 }
0x15bf   :  { %1183 = vrot.lane.b32.xlu0 %v1181_v57, %s1671_s23 }
0x15c1   :  { %v1113_v58 = vpop.permute.xlu0 %1112 }
0x15c2   :  { %v1115_v59 = vmul.f32 %v1113_v58, %v1098_v43 }
0x15c4   :  { %v1116_v60 = vpack.c.bf16 %v1115_v59, %v1115_v59 }
0x15c6   :  { %1186 = vrot.lane.b32.xlu1 %v1116_v60, %s1670_s22 }
0x1631   :  { %v1184_v61 = vpop.permute.xlu0 %1183 }
0x1638   :  { %v1187_v62 = vpop.permute.xlu1 %1186 }
0x1639   :  { %v1190_v63 = vsel %vm124_vm4, %v1184_v61, %v1187_v62 }
0x163a   :  { %1575 = vmatmul.mubr.msk.bf16.vlgmr.msra.gmra.mrb[32].mxu0 %vm224_vm5, %v1190_v63 }
0x170d   :  { %v1227_v2 = vpop.f32.mrb[32].mxu0 }
0x170e   :  { %v1228_v4 = vadd.f32 %v1801_v41, %v1227_v2  ;;  %v1576_v6 = vpop.f32.mrb[33].mxu0  ;;  %v1599_v41 = vld [vmem:[%s2105_s1 + $0x30] sm:$0xff]  }
0x170f   :  { %v1230_v7 = vpop.f32.mrb[34].mxu0  ;;  %1579 = vmatpush3.bf16.msra.mxu1 %v1599_v41 }
0x1710   :  { %1661 = vtanh.f32 %v1228_v4  ;;  %v1577_v9 = vpop.f32.mrb[35].mxu0  ;;  %1580 = vmatprep.subr.bf16.mxu1 %v1667_v0 }
0x1713   :  { %1581 = vmatpush3.bf16.msra.mxu1 %v1600_v19 }
0x171a   :  { %v1662_v10 = vpop.eup %1661 }
0x171b   :  { %v1234_v11 = vmul.f32 0.5, %v1662_v10 }
0x171d   :  { %v1235_v12 = vadd.f32 0.5, %v1234_v11 }
0x171f   :  { %v1236_v13 = vsel %vm1733_vm3, %v1662_v10, %v1235_v12 }
0x1720   :  { %1239 = vrot.lane.b32.xlu0 %v1236_v13, %s1670_s22  ;;  %v1237_v16 = vmul.f32 %v1236_v13, %v1109_v52 }
0x1792   :  { %v1240_v14 = vpop.permute.xlu0 %1239 }
0x1793   :  { %v1242_v15 = vmul.f32 %v1240_v14, %v1236_v13 }
0x1795   :  { %1244 = vrot.lane.b32.xlu1 %v1242_v15, %s1671_s23 }
0x1807   :  { %v1245_v17 = vpop.permute.xlu1 %1244 }
0x1808   :  { %v1247_v18 = vadd.f32 %v1245_v17, %v1237_v16 }
0x180a   :  { %1663 = vtanh.f32 %v1247_v18 }
0x1814   :  { %v1664_v20 = vpop.eup %1663 }
0x1815   :  { %1250 = vrot.lane.b32.xlu0 %v1664_v20, %s1670_s22 }
0x1887   :  { %v1251_v21 = vpop.permute.xlu0 %1250 }
0x1888   :  { %v1253_v22 = vmul.f32 %v1251_v21, %v1236_v13 }
0x188a   :  { %v1254_v23 = vpack.c.bf16 %v1253_v22, %v1253_v22 }
0x188c   :  { %1260 = vrot.lane.b32.xlu1 %v1254_v23, %s1671_s23 }
0x18fe   :  { %v1261_v24 = vpop.permute.xlu1 %1260 }
0x18ff   :  { %1583 = vmatmul.mubr.msk.bf16.vlgmr.msra.gmra.mrb[28].mxu1 %vm124_vm4, %v1261_v24 }
0x19d2   :  { %v1311_v25 = vpop.f32.mrb[28].mxu1 }
0x19d3   :  { %v1312_v28 = vadd.f32 %v1347_v27, %v1311_v25  ;;  %v1584_v26 = vpop.f32.mrb[29].mxu1 }
0x19d4   :  { %v1314_v0 = vpop.f32.mrb[30].mxu1 }
0x19d5   :  { %1665 = vtanh.f32 %v1312_v28  ;;  %v1585_v30 = vpop.f32.mrb[31].mxu1 }
0x19df   :  { %v1666_v32 = vpop.eup %1665 }
0x19e0   :  { %1318 = vst [vmem:[%s2108_s3] sm:$0xff] %v1666_v32 }

</bundles_post_ra>
